<compile_context>
chip_gen: v7x
topology: tpu7x:2x2x1
jax: 0.10.0
libtpu: 0.0.40
codegen_flags: <defaults>
</compile_context>

<pallas_src>
import functools

import jax
import jax.numpy as jnp
from jax.experimental import pallas as pl
from jax.experimental.pallas import tpu as pltpu


# ---------------------------------------------------------------------------
# Fused attention-block kernel (one batch element per grid step)
# ---------------------------------------------------------------------------
def _fused_attn_block_kernel(x_ref, w_qkv_t_ref, w_proj_t_ref, o_ref,
                             *, heads, scale):
    # x_ref:       (1, C, S)   channels-major tokens for this batch element
    # w_qkv_t_ref: (3D, C)     (w_in @ w_qkv)^T        (folded, pre-transposed)
    # w_proj_t_ref:(C, D)      (w_attn_out @ w_out)^T  (folded, pre-transposed)
    x_cs = x_ref[0]                                  # (C, S)
    w_qkv_t = w_qkv_t_ref[...]                       # (3D, C)
    w_proj_t = w_proj_t_ref[...]                     # (C, D)

    three_d = w_qkv_t.shape[0]
    D = three_d // 3
    Dh = D // heads

    # qkv^T = (x_tok @ w_in @ w_qkv)^T  -> (3D, S).  Channels-major keeps the
    # S=256 token axis on the lane dimension for every intermediate.
    qkv_t = jnp.dot(w_qkv_t, x_cs, preferred_element_type=jnp.float32)

    out_t = x_cs.astype(jnp.float32)                 # residual, (C, S)

    for h in range(heads):                           # static unroll (heads=2)
        q_t = qkv_t[h * Dh:(h + 1) * Dh, :]                      # (Dh, S)
        k_t = qkv_t[D + h * Dh:D + (h + 1) * Dh, :]              # (Dh, S)
        v_t = qkv_t[2 * D + h * Dh:2 * D + (h + 1) * Dh, :]      # (Dh, S)

        # scores (S_q, S_k): contract over Dh
        s = jax.lax.dot_general(
            q_t, k_t, (((0,), (0,)), ((), ())),
            preferred_element_type=jnp.float32) * scale          # (S, S)

        # full-tile softmax in f32 (exact division, no approx reciprocal)
        m = jnp.max(s, axis=-1, keepdims=True)
        p = jnp.exp(s - m)
        l = jnp.sum(p, axis=-1, keepdims=True)
        p = p / l

        # attn_h^T = v^T @ p^T  -> (Dh, S): contract over the key axis
        attn_t = jax.lax.dot_general(
            v_t, p, (((1,), (1,)), ((), ())),
            preferred_element_type=jnp.float32)                  # (Dh, S)

        # accumulate this head's slice of the folded output projection
        out_t = out_t + jnp.dot(
            w_proj_t[:, h * Dh:(h + 1) * Dh], attn_t,
            preferred_element_type=jnp.float32)                  # (C, S)

    o_ref[0] = out_t.astype(o_ref.dtype)


# ---------------------------------------------------------------------------
# Wrapper: whole optimized attention block in one pallas_call
# ---------------------------------------------------------------------------
def sd_flash_attention_block(x_nchw, params, *, heads=2):
    """x_nchw: [B, C, H, W] latent feature map -> same shape."""
    B, C, H, W = x_nchw.shape
    S = H * W
    D = params["w_attn_out"].shape[0]
    Dh = D // heads
    scale = 1.0 / (Dh ** 0.5)

    # Exact algebraic folding of back-to-back linear layers (no nonlinearity
    # between them in this block), pre-transposed for channels-major math.
    w_qkv_t = (params["w_in"] @ params["w_qkv"]).T            # (3D, C)
    w_proj_t = (params["w_attn_out"] @ params["w_out"]).T     # (C, D)

    # NCHW -> [B, C, S] is a free reshape (no transpose, no data movement).
    x_cs = x_nchw.reshape(B, C, S)

    kernel = functools.partial(_fused_attn_block_kernel,
                               heads=heads, scale=scale)

    flops = 2 * B * (S * C * 3 * D + 2 * heads * S * S * Dh + S * D * C)
    transcendentals = B * heads * S * S
    bytes_accessed = 4 * (2 * B * C * S + 3 * D * C + C * D)

    out_cs = pl.pallas_call(
        kernel,
        out_shape=jax.ShapeDtypeStruct((B, C, S), x_nchw.dtype),
        grid_spec=pltpu.PrefetchScalarGridSpec(
            num_scalar_prefetch=0,
            grid=(B,),
            in_specs=[
                pl.BlockSpec((1, C, S), lambda b: (b, 0, 0)),   # x (lane-dense)
                pl.BlockSpec((3 * D, C), lambda b: (0, 0)),     # folded QKV wT
                pl.BlockSpec((C, D), lambda b: (0, 0)),         # folded out wT
            ],
            out_specs=pl.BlockSpec((1, C, S), lambda b: (b, 0, 0)),
        ),
        compiler_params=pltpu.CompilerParams(
            dimension_semantics=("parallel",)),                 # 2-way for v7x
        cost_estimate=pl.CostEstimate(
            flops=flops,
            transcendentals=transcendentals,
            bytes_accessed=bytes_accessed),
    )(x_cs, w_qkv_t, w_proj_t)

    # [B, C, S] -> NCHW is again a free reshape.
    return out_cs.reshape(B, C, H, W)


def make_params(key, c_latent=4, d_hidden=32):
    k1, k2, k3, k4 = jax.random.split(key, 4)
    s = 0.05
    return {
        "w_in": s * jax.random.normal(k1, (c_latent, d_hidden), jnp.float32),
        "w_qkv": s * jax.random.normal(k2, (d_hidden, 3 * d_hidden), jnp.float32),
        "w_attn_out": s * jax.random.normal(k3, (d_hidden, d_hidden), jnp.float32),
        "w_out": s * jax.random.normal(k4, (d_hidden, c_latent), jnp.float32),
    }


# ---------------------------------------------------------------------------
# Pure-JAX reference for correctness check
# ---------------------------------------------------------------------------
def reference_block(x_nchw, params, *, heads=2):
    B, C, H, W = x_nchw.shape
    S = H * W
    D = params["w_in"].shape[1]
    Dh = D // heads
    x_tok = jnp.transpose(x_nchw, (0, 2, 3, 1)).reshape(B * S, C)
    h = x_tok @ params["w_in"]
    qkv = h @ params["w_qkv"]
    q, k, v = jnp.split(qkv, 3, axis=-1)

    def to_heads(t):
        return t.reshape(B, S, heads, Dh).transpose(0, 2, 1, 3)

    q, k, v = to_heads(q), to_heads(k), to_heads(v)
    s = jnp.einsum("bhqd,bhkd->bhqk", q, k) / (Dh ** 0.5)
    p = jax.nn.softmax(s, axis=-1)
    attn = jnp.einsum("bhqk,bhkd->bhqd", p, v)
    attn = attn.transpose(0, 2, 1, 3).reshape(B * S, D)
    attn = attn @ params["w_attn_out"]
    out_tok = attn @ params["w_out"] + x_tok
    return out_tok.reshape(B, H, W, C).transpose(0, 3, 1, 2)


# TODO(synk): text encoder, DDIM/PNDM scheduler loop and VAE decode of the
# full StableDiffusionPipeline are entire pretrained networks and are not
# translated; this script implements the FlashAttention UNet block hot path.

if __name__ == "__main__":
    key = jax.random.PRNGKey(0)
    kx, kp = jax.random.split(key)

    # SD latent: B=2, C=4 latent channels, 16x16 spatial  (NCHW)
    x = jax.random.normal(kx, (2, 4, 16, 16), jnp.float32)
    params = make_params(kp, c_latent=4, d_hidden=32)

    out = sd_flash_attention_block(x, params, heads=2)
    out = jax.block_until_ready(out)

    ref = reference_block(x, params, heads=2)
    assert out.shape == x.shape
    if not jnp.allclose(out, ref, atol=1e-4, rtol=1e-4):
        raise AssertionError("Pallas output mismatch vs JAX reference")

    print("KERNEL_OK")
</pallas_src>

<mosaic_0001>
module attributes {stable_mosaic.version = 11 : i64} {
  func.func @_fused_attn_block_kernel(%arg0: i32, %arg1: memref<1x4x256xf32, #tpu.memory_space<vmem>>, %arg2: memref<96x4xf32, #tpu.memory_space<vmem>>, %arg3: memref<4x32xf32, #tpu.memory_space<vmem>>, %arg4: memref<1x4x256xf32, #tpu.memory_space<vmem>>) attributes {dimension_semantics = [#tpu.dimension_semantics<parallel>], iteration_bounds = array<i64: 2>, scalar_prefetch = 0 : i64, scratch_operands = 0 : i64, tpu.core_type = #tpu.core_type<tc>, window_params = [{transform_indices = @transform_0, window_bounds = array<i64: 1, 4, 256>}, {pipeline_mode = #tpu.pipeline_mode<synchronous>, transform_indices = @transform_1, window_bounds = array<i64: 96, 4>}, {pipeline_mode = #tpu.pipeline_mode<synchronous>, transform_indices = @transform_2, window_bounds = array<i64: 4, 32>}, {transform_indices = @transform_3, window_bounds = array<i64: 1, 4, 256>}]} {
    %c0 = arith.constant 0 : index
    %c0_0 = arith.constant 0 : index
    %c0_1 = arith.constant 0 : index
    %0 = vector.load %arg1[%c0, %c0_0, %c0_1] : memref<1x4x256xf32, #tpu.memory_space<vmem>>, vector<1x4x256xf32>
    %1 = vector.shape_cast %0 : vector<1x4x256xf32> to vector<4x256xf32>
    %c0_2 = arith.constant 0 : index
    %c0_3 = arith.constant 0 : index
    %2 = vector.load %arg2[%c0_2, %c0_3] : memref<96x4xf32, #tpu.memory_space<vmem>>, vector<96x4xf32>
    %c0_4 = arith.constant 0 : index
    %c0_5 = arith.constant 0 : index
    %3 = vector.load %arg3[%c0_4, %c0_5] : memref<4x32xf32, #tpu.memory_space<vmem>>, vector<4x32xf32>
    %cst = arith.constant dense<0.000000e+00> : vector<96x256xf32>
    %4 = tpu.matmul %2, %1, %cst {dimension_numbers = #tpu.dot_dimension_numbers<[1], [0], [0], [1], [0, 0, 1, 1], [], []>} : vector<96x4xf32>, vector<4x256xf32>, vector<96x256xf32> -> vector<96x256xf32>
    %5 = vector.extract_strided_slice %4 {offsets = [0, 0], sizes = [16, 256], strides = [1, 1]} : vector<96x256xf32> to vector<16x256xf32>
    %6 = vector.extract_strided_slice %4 {offsets = [32, 0], sizes = [16, 256], strides = [1, 1]} : vector<96x256xf32> to vector<16x256xf32>
    %7 = vector.extract_strided_slice %4 {offsets = [64, 0], sizes = [16, 256], strides = [1, 1]} : vector<96x256xf32> to vector<16x256xf32>
    %cst_6 = arith.constant dense<0.000000e+00> : vector<256x256xf32>
    %8 = tpu.matmul %5, %6, %cst_6 {dimension_numbers = #tpu.dot_dimension_numbers<[0], [0], [1], [1], [0, 1, 1, 1], [], []>} : vector<16x256xf32>, vector<16x256xf32>, vector<256x256xf32> -> vector<256x256xf32>
    %cst_7 = arith.constant 2.500000e-01 : f32
    %9 = vector.broadcast %cst_7 : f32 to vector<256x256xf32>
    %10 = arith.mulf %8, %9 : vector<256x256xf32>
    %cst_8 = arith.constant dense<0xFF800000> : vector<256xf32>
    %11 = vector.multi_reduction <maximumf>, %10, %cst_8 [1] : vector<256x256xf32> to vector<256xf32>
    %12 = vector.shape_cast %11 : vector<256xf32> to vector<256x1xf32>
    %13 = vector.broadcast %12 : vector<256x1xf32> to vector<256x256xf32>
    %14 = arith.subf %10, %13 : vector<256x256xf32>
    %15 = math.exp %14 : vector<256x256xf32>
    %cst_9 = arith.constant dense<0.000000e+00> : vector<256xf32>
    %16 = vector.multi_reduction <add>, %15, %cst_9 [1] : vector<256x256xf32> to vector<256xf32>
    %17 = vector.shape_cast %16 : vector<256xf32> to vector<256x1xf32>
    %18 = vector.broadcast %17 : vector<256x1xf32> to vector<256x256xf32>
    %19 = arith.divf %15, %18 : vector<256x256xf32>
    %cst_10 = arith.constant dense<0.000000e+00> : vector<16x256xf32>
    %20 = tpu.matmul %7, %19, %cst_10 {dimension_numbers = #tpu.dot_dimension_numbers<[1], [1], [0], [0], [0, 0, 1, 0], [], []>} : vector<16x256xf32>, vector<256x256xf32>, vector<16x256xf32> -> vector<16x256xf32>
    %21 = vector.extract_strided_slice %3 {offsets = [0, 0], sizes = [4, 16], strides = [1, 1]} : vector<4x32xf32> to vector<4x16xf32>
    %cst_11 = arith.constant dense<0.000000e+00> : vector<4x256xf32>
    %22 = tpu.matmul %21, %20, %cst_11 {dimension_numbers = #tpu.dot_dimension_numbers<[1], [0], [0], [1], [0, 0, 1, 1], [], []>} : vector<4x16xf32>, vector<16x256xf32>, vector<4x256xf32> -> vector<4x256xf32>
    %23 = arith.addf %1, %22 : vector<4x256xf32>
    %24 = vector.extract_strided_slice %4 {offsets = [16, 0], sizes = [16, 256], strides = [1, 1]} : vector<96x256xf32> to vector<16x256xf32>
    %25 = vector.extract_strided_slice %4 {offsets = [48, 0], sizes = [16, 256], strides = [1, 1]} : vector<96x256xf32> to vector<16x256xf32>
    %26 = vector.extract_strided_slice %4 {offsets = [80, 0], sizes = [16, 256], strides = [1, 1]} : vector<96x256xf32> to vector<16x256xf32>
    %cst_12 = arith.constant dense<0.000000e+00> : vector<256x256xf32>
    %27 = tpu.matmul %24, %25, %cst_12 {dimension_numbers = #tpu.dot_dimension_numbers<[0], [0], [1], [1], [0, 1, 1, 1], [], []>} : vector<16x256xf32>, vector<16x256xf32>, vector<256x256xf32> -> vector<256x256xf32>
    %cst_13 = arith.constant 2.500000e-01 : f32
    %28 = vector.broadcast %cst_13 : f32 to vector<256x256xf32>
    %29 = arith.mulf %27, %28 : vector<256x256xf32>
    %cst_14 = arith.constant dense<0xFF800000> : vector<256xf32>
    %30 = vector.multi_reduction <maximumf>, %29, %cst_14 [1] : vector<256x256xf32> to vector<256xf32>
    %31 = vector.shape_cast %30 : vector<256xf32> to vector<256x1xf32>
    %32 = vector.broadcast %31 : vector<256x1xf32> to vector<256x256xf32>
    %33 = arith.subf %29, %32 : vector<256x256xf32>
    %34 = math.exp %33 : vector<256x256xf32>
    %cst_15 = arith.constant dense<0.000000e+00> : vector<256xf32>
    %35 = vector.multi_reduction <add>, %34, %cst_15 [1] : vector<256x256xf32> to vector<256xf32>
    %36 = vector.shape_cast %35 : vector<256xf32> to vector<256x1xf32>
    %37 = vector.broadcast %36 : vector<256x1xf32> to vector<256x256xf32>
    %38 = arith.divf %34, %37 : vector<256x256xf32>
    %cst_16 = arith.constant dense<0.000000e+00> : vector<16x256xf32>
    %39 = tpu.matmul %26, %38, %cst_16 {dimension_numbers = #tpu.dot_dimension_numbers<[1], [1], [0], [0], [0, 0, 1, 0], [], []>} : vector<16x256xf32>, vector<256x256xf32>, vector<16x256xf32> -> vector<16x256xf32>
    %40 = vector.extract_strided_slice %3 {offsets = [0, 16], sizes = [4, 16], strides = [1, 1]} : vector<4x32xf32> to vector<4x16xf32>
    %cst_17 = arith.constant dense<0.000000e+00> : vector<4x256xf32>
    %41 = tpu.matmul %40, %39, %cst_17 {dimension_numbers = #tpu.dot_dimension_numbers<[1], [0], [0], [1], [0, 0, 1, 1], [], []>} : vector<4x16xf32>, vector<16x256xf32>, vector<4x256xf32> -> vector<4x256xf32>
    %42 = arith.addf %23, %41 : vector<4x256xf32>
    %c0_18 = arith.constant 0 : index
    %c0_19 = arith.constant 0 : index
    %c0_20 = arith.constant 0 : index
    %43 = vector.load %arg4[%c0_18, %c0_19, %c0_20] : memref<1x4x256xf32, #tpu.memory_space<vmem>>, vector<1x4x256xf32>
    %44 = vector.shape_cast %43 : vector<1x4x256xf32> to vector<4x256xf32>
    %45 = vector.shape_cast %42 : vector<4x256xf32> to vector<1x4x256xf32>
    tpu.vector_store %arg4[%c0_18, %c0_19, %c0_20], %45 {strides = array<i32>} : memref<1x4x256xf32, #tpu.memory_space<vmem>>, vector<1x4x256xf32>,
    return
  }
  func.func @transform_0(%arg0: i32) -> (i32, i32, i32) {
    %c0_i32 = arith.constant 0 : i32
    %c0_i32_0 = arith.constant 0 : i32
    %c0_i32_1 = arith.constant 0 : i32
    return %arg0, %c0_i32, %c0_i32_0 : i32, i32, i32
  }
  func.func @transform_1(%arg0: i32) -> (i32, i32) {
    %c0_i32 = arith.constant 0 : i32
    %c0_i32_0 = arith.constant 0 : i32
    %c0_i32_1 = arith.constant 0 : i32
    return %c0_i32, %c0_i32_0 : i32, i32
  }
  func.func @transform_2(%arg0: i32) -> (i32, i32) {
    %c0_i32 = arith.constant 0 : i32
    %c0_i32_0 = arith.constant 0 : i32
    %c0_i32_1 = arith.constant 0 : i32
    return %c0_i32, %c0_i32_0 : i32, i32
  }
  func.func @transform_3(%arg0: i32) -> (i32, i32, i32) {
    %c0_i32 = arith.constant 0 : i32
    %c0_i32_0 = arith.constant 0 : i32
    %c0_i32_1 = arith.constant 0 : i32
    return %arg0, %c0_i32, %c0_i32_0 : i32, i32, i32
  }
}

</mosaic_0001>

<bundles_post_ra>
// kernel: tpu_custom_call.1
= control target key start
LH: loop header
LB: loop body
LE: loop exit
PB: predicated region body
PF: predicated region fallthrough
CT: control target
= control target key end

     0   :  { %8 = vsyncpa [#allocation3], 0  ;;  %s4883_s0 = inlined_call_operand.vmem [shape: f32[2,4,256], index: 0, kind: input, shape index: {}]   ;;  %s4884_s1 = inlined_call_operand.vmem [shape: f32[96,4], index: 1, kind: input, shape index: {}]   ;;  %s4885_s2 = inlined_call_operand.vmem [shape: f32[4,32], index: 2, kind: input, shape index: {}]   ;;  %s4886_s3 = inlined_call_operand.hbm [shape: f32[2,4,256], index: 3, kind: output, shape index: {}]  }
   0x1   :  { %10 = vsyncpa [#allocation3 + $0x1], 0  ;;  %s3428_s12 = smov 0   ;;  %s3430_s13 = smov 0  }
   0x2   :  { %s3432_s14 = smov 0   ;;  %s3434_s15 = smov 0  }
   0x3 LB: > { %s3449_s16 = sadd.s32 4294967295, %s3403_s15   ;;  %s2675_s17 = sadd.s32 4294967294, %s3403_s15   ;;  %s3403_s15 = sphi %s3434_s15, %s5083_s15   ;;  %s3399_s14 = sphi %s3432_s14, %s5082_s14   ;;  %s3395_s13 = sphi %s3430_s13, %s5081_s13   ;;  %s3391_s12 = sphi %s3428_s12, %s5080_s12  }
   0x4   : > { %s3453_s18 = sadd.s32 1, %s3403_s15   ;;  %s91_s19 = sadd.s32 1, %s3399_s14 }
   0x5   : > { %s88_s20 = ssub.s32 %s3403_s15, %s3453_s18  ;;  %p101_p0 = scmp.ne.s32.totalorder %s3399_s14, %s3395_s13 }
   0x6   : > { %p89_p1 = scmp.eq.s32.totalorder %s88_s20, 0  ;;  %p102_p2 = scmp.eq.s32.totalorder %s3449_s16, 1 }
   0x7   : > { %p107_p3 = scmp.ne.s32.totalorder %s3395_s13, %s3391_s12  ;;  %p108_p4 = scmp.eq.s32.totalorder %s2675_s17, 1 }
   0x8   : > { %s3464_s21 = scalar_select %p89_p1, %s3399_s14, %s91_s19  }
   0x9   : > { %p3466_p5 = por %p102_p2, %p101_p0  ;;  %p3470_p6 = por %p108_p4, %p107_p3 }
   0xa   : > { %p2678_p7 = scmp.ge.s32.totalorder %s3403_s15, 1  ;;  %p140_p8 = scmp.lt.s32.totalorder %s3403_s15, 3 }
   0xc   : > { %p141_p9 = pnand %p2678_p7, %p140_p8 }
   0xe   : > { %144 = sbr.rel (%p141_p9) target bundleno = 2522 (0x9da), region = 32 }
  0x15   : > { %p164_p10 = scmp.lt.s32.totalorder %s3449_s16, 1  ;;  %v4887_v0 = vmov 0.0   ;;  %vm222_vm0 = vcmask 1043456   ;;  %v170_v3 = vld [vmem:[%s4884_s1] sm:$0xff]  ;;  %vm185_vm1 = vcmask 31744   ;;  %v171_v4 = vld [vmem:[%s4884_s1 + $0x8] sm:$0xff] }
  0x16   : > { %291 = vmatprep.mubr.f32.mxu0 %v4887_v0  ;;  %589 = vmatprep.mubr.f32.mxu1 %v4887_v0  ;;  %v172_v5 = vld [vmem:[%s4884_s1 + $0x10] sm:$0xff]  ;;  %v173_v6 = vld [vmem:[%s4884_s1 + $0x18] sm:$0xff]  ;;  %v174_v7 = vld [vmem:[%s4884_s1 + $0x20] sm:$0xff]  ;;  %vm428_vm2 = vcmask 130048   ;;  %s3406_s19 = smov 112   ;;  %s161_s20 = sand.u32 1, %s3395_s13  }
  0x17   : > { %s165_s24 = scalar_select %p164_p10, %s3449_s16, 1  ;;  %v175_v8 = vld [vmem:[%s4884_s1 + $0x28] sm:$0xff] }
  0x19   : > { %s2767_s25 = sshll.u32 %s165_s24, 3  ;;  %s2679_s24 = sshll.u32 %s161_s20, 3 }
  0x1a   : > { %s3483_s28 = scalar_lea.vmem %s4883_s0, %s2767_s25  ;;  %s2768_s25 = sshll.u32 %s3449_s16, 7 }
  0x1b   : > { %v169_v1 = vld [vmem:[%s3483_s28] sm:$0xff]  ;;  %s163_s26 = scalar_lea.vmem [#allocation2], %s2679_s24  ;;  %s4841_s4 = scalar_lea.hbm %s4886_s3, %s2768_s25 }
  0x1c   : > { %v184_v2 = vcombine.high %v169_v1, %v169_v1  ;;  %s2616_s27 = sshll.u32 %s163_s26, 4  ;;  %s2602_s16 = scalar_lea.sflag [#allocation3], %s161_s20  ;;  %s4843_s27 = int_to_ptr.vmem [resolvable:$true] %s2616_s27 }
  0x1d   : > { %s3341_s5 = scalar_lea.vmem %s4843_s27, 128 }
  0x1e   : > { %2682 = vmatprep.subr.msk.mxu0 %vm222_vm0, %v184_v2  ;;  %p3342_p11 = scmp.ne.s32.totalorder %s4843_s27, %s3341_s5 }
  0x1f   : > { %2683 = vmatpush1.msk.msra.mxu0 %vm222_vm0, %v169_v1 }
  0x20   : > { %2684 = vmatmul.mubr.msk.f32.vlgmr.msra.gmra.mrb[0].mxu0 %vm185_vm1, %v170_v3  ;;  %p3343_p12 = pnand %p3342_p11, %p3466_p5 }
  0x21   : > { %297 = vmatprep.mubr.f32.mxu0 %v4887_v0 }
  0x22   : > { %p3344_p13 = pneg %p3343_p12 }
  0x24   : > { %2685 = vmatmul.mubr.msk.f32.gmra.mrb[2].mxu0 %vm185_vm1, %v171_v4 }
  0x25   : > { %303 = vmatprep.mubr.f32.mxu0 %v4887_v0 }
  0x28   : > { %2686 = vmatmul.mubr.msk.f32.gmra.mrb[4].mxu0 %vm185_vm1, %v172_v5 }
  0x29   : > { %309 = vmatprep.mubr.f32.mxu0 %v4887_v0 }
  0x2c   : > { %2687 = vmatmul.mubr.msk.f32.gmra.mrb[6].mxu0 %vm185_vm1, %v173_v6 }
  0x2d   : > { %315 = vmatprep.mubr.f32.mxu0 %v4887_v0 }
  0x30   : > { %2688 = vmatmul.mubr.msk.f32.gmra.mrb[8].mxu0 %vm185_vm1, %v174_v7 }
  0x31   : > { %321 = vmatprep.mubr.f32.mxu0 %v4887_v0 }
  0x34   : > { %2689 = vmatmul.mubr.msk.f32.gmra.mrb[10].mxu0 %vm185_vm1, %v175_v8 }
  0x35   : > { %327 = vmatprep.mubr.f32.mxu0 %v4887_v0 }
  0xf3   : > { %v293_v9 = vpop.f32.mrb[0].mxu0 }
  0xf4   : > { %364 = vxpose.xlu0.b32.start [1/2] (short) %v293_v9, 128  ;;  %v295_v10 = vpop.f32.mrb[1].mxu0 }
  0xf5   : > { %396 = vxpose.xlu1.b32.start [1/2] (short) %v295_v10, 128 }
  0xf7   : > { %v299_v11 = vpop.f32.mrb[2].mxu0 }
  0xf8   : > { %365 = vxpose.xlu0.b32.end [2/2] (short) %v299_v11, 128  ;;  %v301_v12 = vpop.f32.mrb[3].mxu0 }
  0xf9   : > { %397 = vxpose.xlu1.b32.end [2/2] (short) %v301_v12, 128 }
  0xfb   : > { %v3516_v13 = vpop.f32.mrb[4].mxu0 }
  0xfc   : > { %4949 = vst [vmem:[#allocation5_spill] sm:$0xff] %v3516_v13  ;;  %v3518_v14 = vpop.f32.mrb[5].mxu0 }
  0xfd   : > { %4950 = vst [vmem:[#allocation6_spill] sm:$0xff] %v3518_v14 }
  0xff   : > { %v3520_v15 = vpop.f32.mrb[6].mxu0 }
 0x100   : > { %4951 = vst [vmem:[#allocation7_spill] sm:$0xff] %v3520_v15  ;;  %v3522_v16 = vpop.f32.mrb[7].mxu0 }
 0x101   : > { %4952 = vst [vmem:[#allocation8_spill] sm:$0xff] %v3522_v16 }
 0x103   : > { %v317_v17 = vpop.f32.mrb[8].mxu0 }
 0x104   : > { %v319_v18 = vpop.f32.mrb[9].mxu0 }
 0x107   : > { %v323_v19 = vpop.f32.mrb[10].mxu0 }
 0x108   : > { %v2771_v20 = vpack.c.bf16 %v323_v19, %v317_v17  ;;  %v325_v21 = vpop.f32.mrb[11].mxu0 }
 0x109   : > { %v2769_v22 = vpack.c.bf16 %v325_v21, %v319_v18 }
 0x10b   : > { %2770 = vmatprep.subr.bf16.mxu1 %v2769_v22 }
 0x10c   : > { %2772 = vmatpush1.bf16.msra.mxu1 %v2771_v20 }
 0x174   : > { %v380_v23 = vpop.trf.xlu0 }
 0x175   : > { %2696 = vmatmul.mubr.msk.f32.vlgmr.msra.gmra.mrb[0].mxu1 %vm428_vm2, %v380_v23  ;;  %v412_v32 = vpop.trf.xlu1 }
 0x176   : > { %595 = vmatprep.mubr.f32.mxu1 %v4887_v0 }
 0x178   : > { %v381_v24 = vpop.trf.xlu0 }
 0x179   : > { %2697 = vmatmul.mubr.msk.f32.gmra.mrb[2].mxu1 %vm428_vm2, %v381_v24  ;;  %v413_v35 = vpop.trf.xlu1 }
 0x17a   : > { %601 = vmatprep.mubr.f32.mxu1 %v4887_v0 }
 0x17c   : > { %v382_v25 = vpop.trf.xlu0 }
 0x17d   : > { %2698 = vmatmul.mubr.msk.f32.gmra.mrb[4].mxu1 %vm428_vm2, %v382_v25  ;;  %v414_v37 = vpop.trf.xlu1 }
 0x17e   : > { %607 = vmatprep.mubr.f32.mxu1 %v4887_v0 }
 0x180   : > { %v383_v26 = vpop.trf.xlu0 }
 0x181   : > { %2699 = vmatmul.mubr.msk.f32.gmra.mrb[6].mxu1 %vm428_vm2, %v383_v26  ;;  %v415_v40 = vpop.trf.xlu1 }
 0x182   : > { %613 = vmatprep.mubr.f32.mxu1 %v4887_v0 }
 0x184   : > { %v384_v27 = vpop.trf.xlu0 }
 0x185   : > { %2700 = vmatmul.mubr.msk.f32.gmra.mrb[8].mxu1 %vm428_vm2, %v384_v27  ;;  %v416_v42 = vpop.trf.xlu1 }
 0x186   : > { %619 = vmatprep.mubr.f32.mxu1 %v4887_v0 }
 0x188   : > { %v385_v28 = vpop.trf.xlu0 }
 0x189   : > { %2701 = vmatmul.mubr.msk.f32.gmra.mrb[10].mxu1 %vm428_vm2, %v385_v28  ;;  %v417_v44 = vpop.trf.xlu1 }
 0x18a   : > { %625 = vmatprep.mubr.f32.mxu1 %v4887_v0 }
 0x18c   : > { %v386_v29 = vpop.trf.xlu0 }
 0x18d   : > { %2702 = vmatmul.mubr.msk.f32.gmra.mrb[12].mxu1 %vm428_vm2, %v386_v29  ;;  %v418_v45 = vpop.trf.xlu1 }
 0x18e   : > { %631 = vmatprep.mubr.f32.mxu1 %v4887_v0 }
 0x190   : > { %v387_v30 = vpop.trf.xlu0 }
 0x191   : > { %2703 = vmatmul.mubr.msk.f32.gmra.mrb[14].mxu1 %vm428_vm2, %v387_v30  ;;  %v419_v46 = vpop.trf.xlu1 }
 0x192   : > { %637 = vmatprep.mubr.f32.mxu1 %v4887_v0 }
 0x194   : > { %v388_v31 = vpop.trf.xlu0 }
 0x195   : > { %2704 = vmatmul.mubr.msk.f32.gmra.mrb[16].mxu1 %vm428_vm2, %v388_v31  ;;  %v420_v47 = vpop.trf.xlu1 }
 0x196   : > { %643 = vmatprep.mubr.f32.mxu1 %v4887_v0 }
 0x198   : > { %v389_v33 = vpop.trf.xlu0 }
 0x199   : > { %2705 = vmatmul.mubr.msk.f32.gmra.mrb[18].mxu1 %vm428_vm2, %v389_v33  ;;  %v421_v48 = vpop.trf.xlu1 }
 0x19a   : > { %649 = vmatprep.mubr.f32.mxu1 %v4887_v0 }
 0x19c   : > { %v390_v34 = vpop.trf.xlu0 }
 0x19d   : > { %2706 = vmatmul.mubr.msk.f32.gmra.mrb[20].mxu1 %vm428_vm2, %v390_v34  ;;  %v422_v49 = vpop.trf.xlu1 }
 0x19e   : > { %655 = vmatprep.mubr.f32.mxu1 %v4887_v0 }
 0x1a0   : > { %v391_v36 = vpop.trf.xlu0 }
 0x1a1   : > { %2707 = vmatmul.mubr.msk.f32.gmra.mrb[22].mxu1 %vm428_vm2, %v391_v36  ;;  %v423_v50 = vpop.trf.xlu1 }
 0x1a2   : > { %661 = vmatprep.mubr.f32.mxu1 %v4887_v0 }
 0x1a4   : > { %v392_v38 = vpop.trf.xlu0 }
 0x1a5   : > { %2708 = vmatmul.mubr.msk.f32.gmra.mrb[24].mxu1 %vm428_vm2, %v392_v38  ;;  %v424_v51 = vpop.trf.xlu1 }
 0x1a6   : > { %667 = vmatprep.mubr.f32.mxu1 %v4887_v0 }
 0x1a8   : > { %v393_v39 = vpop.trf.xlu0 }
 0x1a9   : > { %2709 = vmatmul.mubr.msk.f32.gmra.mrb[26].mxu1 %vm428_vm2, %v393_v39  ;;  %v425_v52 = vpop.trf.xlu1 }
 0x1aa   : > { %673 = vmatprep.mubr.f32.mxu1 %v4887_v0 }
 0x1ac   : > { %v394_v41 = vpop.trf.xlu0 }
 0x1ad   : > { %2710 = vmatmul.mubr.msk.f32.gmra.mrb[28].mxu1 %vm428_vm2, %v394_v41  ;;  %v426_v53 = vpop.trf.xlu1 }
 0x1ae   : > { %679 = vmatprep.mubr.f32.mxu1 %v4887_v0 }
 0x1b0   : > { %v395_v43 = vpop.trf.xlu0 }
 0x1b1   : > { %2711 = vmatmul.mubr.msk.f32.gmra.mrb[30].mxu1 %vm428_vm2, %v395_v43  ;;  %v427_v54 = vpop.trf.xlu1 }
 0x1b2   : > { %685 = vmatprep.mubr.f32.mxu1 %v4887_v0 }
 0x1b5   : > { %2712 = vmatmul.mubr.msk.f32.gmra.mrb[32].mxu1 %vm428_vm2, %v412_v32 }
 0x1b6   : > { %691 = vmatprep.mubr.f32.mxu1 %v4887_v0 }
 0x1b9   : > { %2713 = vmatmul.mubr.msk.f32.gmra.mrb[34].mxu1 %vm428_vm2, %v413_v35 }
 0x1ba   : > { %697 = vmatprep.mubr.f32.mxu1 %v4887_v0 }
 0x1bd   : > { %2714 = vmatmul.mubr.msk.f32.gmra.mrb[36].mxu1 %vm428_vm2, %v414_v37 }
 0x1be   : > { %703 = vmatprep.mubr.f32.mxu1 %v4887_v0 }
 0x1c1   : > { %2715 = vmatmul.mubr.msk.f32.gmra.mrb[38].mxu1 %vm428_vm2, %v415_v40 }
 0x1c2   : > { %709 = vmatprep.mubr.f32.mxu1 %v4887_v0 }
 0x1c5   : > { %2716 = vmatmul.mubr.msk.f32.gmra.mrb[40].mxu1 %vm428_vm2, %v416_v42 }
 0x1c6   : > { %715 = vmatprep.mubr.f32.mxu1 %v4887_v0 }
 0x1c9   : > { %2717 = vmatmul.mubr.msk.f32.gmra.mrb[42].mxu1 %vm428_vm2, %v417_v44 }
 0x1ca   : > { %721 = vmatprep.mubr.f32.mxu1 %v4887_v0 }
 0x1cd   : > { %2718 = vmatmul.mubr.msk.f32.gmra.mrb[44].mxu1 %vm428_vm2, %v418_v45 }
 0x1ce   : > { %727 = vmatprep.mubr.f32.mxu1 %v4887_v0 }
 0x1d1   : > { %2719 = vmatmul.mubr.msk.f32.gmra.mrb[46].mxu1 %vm428_vm2, %v419_v46 }
 0x1d2   : > { %733 = vmatprep.mubr.f32.mxu1 %v4887_v0 }
 0x1d5   : > { %2720 = vmatmul.mubr.msk.f32.gmra.mrb[48].mxu1 %vm428_vm2, %v420_v47 }
 0x1d6   : > { %739 = vmatprep.mubr.f32.mxu1 %v4887_v0 }
 0x1d9   : > { %2721 = vmatmul.mubr.msk.f32.gmra.mrb[50].mxu1 %vm428_vm2, %v421_v48 }
 0x1da   : > { %745 = vmatprep.mubr.f32.mxu1 %v4887_v0 }
 0x1dd   : > { %2722 = vmatmul.mubr.msk.f32.gmra.mrb[52].mxu1 %vm428_vm2, %v422_v49 }
 0x1de   : > { %751 = vmatprep.mubr.f32.mxu1 %v4887_v0 }
 0x1e1   : > { %2723 = vmatmul.mubr.msk.f32.gmra.mrb[54].mxu1 %vm428_vm2, %v423_v50 }
 0x1e2   : > { %757 = vmatprep.mubr.f32.mxu1 %v4887_v0 }
 0x1e5   : > { %2724 = vmatmul.mubr.msk.f32.gmra.mrb[56].mxu1 %vm428_vm2, %v424_v51 }
 0x1e6   : > { %763 = vmatprep.mubr.f32.mxu1 %v4887_v0 }
 0x1e9   : > { %2725 = vmatmul.mubr.msk.f32.gmra.mrb[58].mxu1 %vm428_vm2, %v425_v52 }
 0x1ea   : > { %769 = vmatprep.mubr.f32.mxu1 %v4887_v0 }
 0x1ed   : > { %2726 = vmatmul.mubr.msk.f32.gmra.mrb[60].mxu1 %vm428_vm2, %v426_v53 }
 0x1ee   : > { %775 = vmatprep.mubr.f32.mxu1 %v4887_v0 }
 0x1f1   : > { %2727 = vmatmul.mubr.msk.f32.gmra.mrb[62].mxu1 %vm428_vm2, %v427_v54 }
 0x1f2   : > { %1470 = vmatprep.mubr.f32.mxu1 %v4887_v0 }
 0x248   : > { %v591_v55 = vpop.f32.mrb[0].mxu1 }
 0x249   : > { %v3588_v56 = vmul.f32 0.25, %v591_v55  ;;  %v593_v57 = vpop.f32.mrb[1].mxu1 }
 0x24a   : > { %v3590_v58 = vmul.f32 0.25, %v593_v57 }
 0x24c   : > { %v597_v59 = vpop.f32.mrb[2].mxu1  ;;  %v846_v60 = vmax.f32 %v3588_v56, %v3590_v58 }
 0x24d   : > { %v3594_v61 = vmul.f32 0.25, %v597_v59  ;;  %v599_v62 = vpop.f32.mrb[3].mxu1 }
 0x24e   : > { %v3596_v63 = vmul.f32 0.25, %v599_v62  ;;  %847 = vmax.xlane.f32.xlu0 %v846_v60 }
 0x250   : > { %v603_v1 = vpop.f32.mrb[4].mxu1  ;;  %v849_v2 = vmax.f32 %v3594_v61, %v3596_v63 }
 0x251   : > { %v3600_v3 = vmul.f32 0.25, %v603_v1  ;;  %v605_v4 = vpop.f32.mrb[5].mxu1 }
 0x252   : > { %v3602_v5 = vmul.f32 0.25, %v605_v4  ;;  %850 = vmax.xlane.f32.xlu1 %v849_v2 }
 0x254   : > { %v609_v6 = vpop.f32.mrb[6].mxu1  ;;  %v852_v7 = vmax.f32 %v3600_v3, %v3602_v5 }
 0x255   : > { %v3606_v8 = vmul.f32 0.25, %v609_v6  ;;  %v611_v9 = vpop.f32.mrb[7].mxu1 }
 0x256   : > { %v3608_v10 = vmul.f32 0.25, %v611_v9  ;;  %853 = vmax.xlane.f32.xlu1 %v852_v7 }
 0x258   : > { %v615_v11 = vpop.f32.mrb[8].mxu1  ;;  %v855_v12 = vmax.f32 %v3606_v8, %v3608_v10 }
 0x259   : > { %v3612_v17 = vmul.f32 0.25, %v615_v11  ;;  %v617_v18 = vpop.f32.mrb[9].mxu1 }
 0x25a   : > { %v3614_v19 = vmul.f32 0.25, %v617_v18  ;;  %856 = vmax.xlane.f32.xlu1 %v855_v12 }
 0x25c   : > { %v621_v20 = vpop.f32.mrb[10].mxu1  ;;  %v858_v21 = vmax.f32 %v3612_v17, %v3614_v19 }
 0x25d   : > { %v3618_v22 = vmul.f32 0.25, %v621_v20  ;;  %v623_v23 = vpop.f32.mrb[11].mxu1 }
 0x25e   : > { %v3620_v24 = vmul.f32 0.25, %v623_v23  ;;  %859 = vmax.xlane.f32.xlu0 %v858_v21 }
 0x260   : > { %v627_v25 = vpop.f32.mrb[12].mxu1  ;;  %v861_v26 = vmax.f32 %v3618_v22, %v3620_v24 }
 0x261   : > { %v3624_v27 = vmul.f32 0.25, %v627_v25  ;;  %v629_v28 = vpop.f32.mrb[13].mxu1 }
 0x262   : > { %v3626_v29 = vmul.f32 0.25, %v629_v28  ;;  %862 = vmax.xlane.f32.xlu1 %v861_v26 }
 0x264   : > { %v633_v30 = vpop.f32.mrb[14].mxu1  ;;  %v864_v31 = vmax.f32 %v3624_v27, %v3626_v29 }
 0x265   : > { %v3630_v32 = vmul.f32 0.25, %v633_v30  ;;  %v635_v33 = vpop.f32.mrb[15].mxu1 }
 0x266   : > { %v3632_v34 = vmul.f32 0.25, %v635_v33  ;;  %865 = vmax.xlane.f32.xlu0 %v864_v31 }
 0x268   : > { %v639_v35 = vpop.f32.mrb[16].mxu1  ;;  %v867_v36 = vmax.f32 %v3630_v32, %v3632_v34 }
 0x269   : > { %v3636_v37 = vmul.f32 0.25, %v639_v35  ;;  %v641_v38 = vpop.f32.mrb[17].mxu1 }
 0x26a   : > { %v3638_v39 = vmul.f32 0.25, %v641_v38  ;;  %868 = vmax.xlane.f32.xlu1 %v867_v36 }
 0x26c   : > { %v645_v40 = vpop.f32.mrb[18].mxu1  ;;  %v870_v41 = vmax.f32 %v3636_v37, %v3638_v39 }
 0x26d   : > { %v3642_v42 = vmul.f32 0.25, %v645_v40  ;;  %v647_v43 = vpop.f32.mrb[19].mxu1 }
 0x26e   : > { %v3644_v44 = vmul.f32 0.25, %v647_v43  ;;  %871 = vmax.xlane.f32.xlu0 %v870_v41 }
 0x270   : > { %v651_v45 = vpop.f32.mrb[20].mxu1  ;;  %v873_v46 = vmax.f32 %v3642_v42, %v3644_v44 }
 0x271   : > { %v3648_v47 = vmul.f32 0.25, %v651_v45  ;;  %v653_v48 = vpop.f32.mrb[21].mxu1 }
 0x272   : > { %v3650_v49 = vmul.f32 0.25, %v653_v48  ;;  %874 = vmax.xlane.f32.xlu1 %v873_v46 }
 0x274   : > { %v657_v50 = vpop.f32.mrb[22].mxu1  ;;  %v876_v51 = vmax.f32 %v3648_v47, %v3650_v49 }
 0x275   : > { %v3654_v52 = vmul.f32 0.25, %v657_v50  ;;  %v659_v53 = vpop.f32.mrb[23].mxu1 }
 0x276   : > { %v3656_v54 = vmul.f32 0.25, %v659_v53  ;;  %877 = vmax.xlane.f32.xlu0 %v876_v51 }
 0x278   : > { %v663_v55 = vpop.f32.mrb[24].mxu1  ;;  %v879_v57 = vmax.f32 %v3654_v52, %v3656_v54 }
 0x279   : > { %v3660_v59 = vmul.f32 0.25, %v663_v55  ;;  %v665_v60 = vpop.f32.mrb[25].mxu1 }
 0x27a   : > { %v3662_v62 = vmul.f32 0.25, %v665_v60  ;;  %880 = vmax.xlane.f32.xlu1 %v879_v57 }
 0x27c   : > { %v669_v1 = vpop.f32.mrb[26].mxu1  ;;  %v882_v2 = vmax.f32 %v3660_v59, %v3662_v62 }
 0x27d   : > { %v3666_v4 = vmul.f32 0.25, %v669_v1  ;;  %v671_v6 = vpop.f32.mrb[27].mxu1 }
 0x27e   : > { %v3668_v7 = vmul.f32 0.25, %v671_v6  ;;  %883 = vmax.xlane.f32.xlu0 %v882_v2 }
 0x280   : > { %v675_v9 = vpop.f32.mrb[28].mxu1  ;;  %v885_v11 = vmax.f32 %v3666_v4, %v3668_v7 }
 0x281   : > { %v3672_v12 = vmul.f32 0.25, %v675_v9  ;;  %v677_v18 = vpop.f32.mrb[29].mxu1 }
 0x282   : > { %v3674_v20 = vmul.f32 0.25, %v677_v18  ;;  %886 = vmax.xlane.f32.xlu1 %v885_v11 }
 0x284   : > { %v681_v21 = vpop.f32.mrb[30].mxu1  ;;  %v888_v23 = vmax.f32 %v3672_v12, %v3674_v20 }
 0x285   : > { %v3678_v25 = vmul.f32 0.25, %v681_v21  ;;  %v683_v26 = vpop.f32.mrb[31].mxu1 }
 0x286   : > { %v3680_v28 = vmul.f32 0.25, %v683_v26  ;;  %889 = vmax.xlane.f32.xlu0 %v888_v23 }
 0x288   : > { %v687_v30 = vpop.f32.mrb[32].mxu1  ;;  %v891_v31 = vmax.f32 %v3678_v25, %v3680_v28 }
 0x289   : > { %v3684_v33 = vmul.f32 0.25, %v687_v30  ;;  %v689_v35 = vpop.f32.mrb[33].mxu1 }
 0x28a   : > { %v3686_v36 = vmul.f32 0.25, %v689_v35  ;;  %892 = vmax.xlane.f32.xlu1 %v891_v31 }
 0x28c   : > { %v693_v38 = vpop.f32.mrb[34].mxu1  ;;  %v894_v40 = vmax.f32 %v3684_v33, %v3686_v36 }
 0x28d   : > { %v3690_v41 = vmul.f32 0.25, %v693_v38  ;;  %v695_v43 = vpop.f32.mrb[35].mxu1 }
 0x28e   : > { %v3692_v45 = vmul.f32 0.25, %v695_v43  ;;  %895 = vmax.xlane.f32.xlu0 %v894_v40 }
 0x28f   : > { %4953 = vst [vmem:[#allocation9_spill] sm:$0xff] %v3690_v41 }
 0x290   : > { %4954 = vst [vmem:[#allocation10_spill] sm:$0xff] %v3692_v45  ;;  %v699_v46 = vpop.f32.mrb[36].mxu1  ;;  %v897_v48 = vmax.f32 %v3690_v41, %v3692_v45 }
 0x291   : > { %v3696_v50 = vmul.f32 0.25, %v699_v46  ;;  %v701_v51 = vpop.f32.mrb[37].mxu1 }
 0x292   : > { %v3698_v53 = vmul.f32 0.25, %v701_v51  ;;  %898 = vmax.xlane.f32.xlu1 %v897_v48 }
 0x293   : > { %4955 = vst [vmem:[#allocation11_spill] sm:$0xff] %v3696_v50 }
 0x294   : > { %4956 = vst [vmem:[#allocation12_spill] sm:$0xff] %v3698_v53  ;;  %v705_v55 = vpop.f32.mrb[38].mxu1  ;;  %v900_v57 = vmax.f32 %v3696_v50, %v3698_v53 }
 0x295   : > { %v3702_v60 = vmul.f32 0.25, %v705_v55  ;;  %v707_v1 = vpop.f32.mrb[39].mxu1 }
 0x296   : > { %v3704_v2 = vmul.f32 0.25, %v707_v1  ;;  %901 = vmax.xlane.f32.xlu0 %v900_v57 }
 0x297   : > { %4957 = vst [vmem:[#allocation13_spill] sm:$0xff] %v3702_v60 }
 0x298   : > { %4958 = vst [vmem:[#allocation14_spill] sm:$0xff] %v3704_v2  ;;  %v711_v6 = vpop.f32.mrb[40].mxu1  ;;  %v903_v9 = vmax.f32 %v3702_v60, %v3704_v2 }
 0x299   : > { %v3708_v11 = vmul.f32 0.25, %v711_v6  ;;  %v713_v18 = vpop.f32.mrb[41].mxu1 }
 0x29a   : > { %v3710_v21 = vmul.f32 0.25, %v713_v18  ;;  %904 = vmax.xlane.f32.xlu1 %v903_v9 }
 0x29b   : > { %4959 = vst [vmem:[#allocation15_spill] sm:$0xff] %v3708_v11 }
 0x29c   : > { %4960 = vst [vmem:[#allocation16_spill] sm:$0xff] %v3710_v21  ;;  %v717_v23 = vpop.f32.mrb[42].mxu1  ;;  %v906_v26 = vmax.f32 %v3708_v11, %v3710_v21 }
 0x29d   : > { %v3714_v30 = vmul.f32 0.25, %v717_v23  ;;  %v719_v31 = vpop.f32.mrb[43].mxu1 }
 0x29e   : > { %v3716_v35 = vmul.f32 0.25, %v719_v31  ;;  %907 = vmax.xlane.f32.xlu0 %v906_v26 }
 0x29f   : > { %4961 = vst [vmem:[#allocation17_spill] sm:$0xff] %v3714_v30 }
 0x2a0   : > { %4962 = vst [vmem:[#allocation18_spill] sm:$0xff] %v3716_v35  ;;  %v723_v38 = vpop.f32.mrb[44].mxu1  ;;  %v909_v40 = vmax.f32 %v3714_v30, %v3716_v35 }
 0x2a1   : > { %v3720_v43 = vmul.f32 0.25, %v723_v38  ;;  %v725_v46 = vpop.f32.mrb[45].mxu1 }
 0x2a2   : > { %v3722_v48 = vmul.f32 0.25, %v725_v46  ;;  %910 = vmax.xlane.f32.xlu1 %v909_v40 }
 0x2a3   : > { %4963 = vst [vmem:[#allocation19_spill] sm:$0xff] %v3720_v43 }
 0x2a4   : > { %4964 = vst [vmem:[#allocation20_spill] sm:$0xff] %v3722_v48  ;;  %v729_v51 = vpop.f32.mrb[46].mxu1  ;;  %v912_v55 = vmax.f32 %v3720_v43, %v3722_v48  ;;  %v177_v48 = vld [vmem:[%s4884_s1 + $0x38] sm:$0xff]  ;;  %v178_v43 = vld [vmem:[%s4884_s1 + $0x40] sm:$0xff] }
 0x2a5   : > { %v3726_v57 = vmul.f32 0.25, %v729_v51  ;;  %v731_v1 = vpop.f32.mrb[47].mxu1 }
 0x2a6   : > { %v3728_v6 = vmul.f32 0.25, %v731_v1  ;;  %913 = vmax.xlane.f32.xlu0 %v912_v55 }
 0x2a7   : > { %4965 = vst [vmem:[#allocation21_spill] sm:$0xff] %v3726_v57 }
 0x2a8   : > { %4966 = vst [vmem:[#allocation22_spill] sm:$0xff] %v3728_v6  ;;  %v915_v9 = vmax.f32 %v3726_v57, %v3728_v6  ;;  %v735_v18 = vpop.f32.mrb[48].mxu1  ;;  %v176_v6 = vld [vmem:[%s4884_s1 + $0x30] sm:$0xff]  ;;  %v4967_v57 = vmov 0.0  }
 0x2a9   : > { %v737_v23 = vpop.f32.mrb[49].mxu1  ;;  %2690 = vmatmul.mubr.msk.f32.gmra.mrb[12].mxu0 %vm185_vm1, %v176_v6 }
 0x2aa   : > { %916 = vmax.xlane.f32.xlu1 %v915_v9  ;;  %333 = vmatprep.mubr.f32.mxu0 %v4967_v57 }
 0x2ac   : > { %v3732_v26 = vpop.f32.mrb[50].mxu1 }
 0x2ad   : > { %v3734_v31 = vpop.f32.mrb[51].mxu1  ;;  %2691 = vmatmul.mubr.msk.f32.gmra.mrb[14].mxu0 %vm185_vm1, %v177_v48 }
 0x2ae   : > { %339 = vmatprep.mubr.f32.mxu0 %v4967_v57 }
 0x2b0   : > { %v3736_v38 = vpop.f32.mrb[52].mxu1 }
 0x2b1   : > { %v3738_v40 = vpop.f32.mrb[53].mxu1  ;;  %2692 = vmatmul.mubr.msk.f32.gmra.mrb[16].mxu0 %vm185_vm1, %v178_v43 }
 0x2b2   : > { %345 = vmatprep.mubr.f32.mxu0 %v4967_v57 }
 0x2b4   : > { %v3740_v46 = vpop.f32.mrb[54].mxu1 }
 0x2b5   : > { %v3742_v51 = vpop.f32.mrb[55].mxu1 }
 0x2b8   : > { %v3744_v1 = vpop.f32.mrb[56].mxu1 }
 0x2b9   : > { %v3746_v55 = vpop.f32.mrb[57].mxu1 }
 0x2bc   : > { %v3748_v0 = vpop.f32.mrb[58].mxu1 }
 0x2bd   : > { %v3750_v16 = vpop.f32.mrb[59].mxu1 }
 0x2c0   : > { %v3752_v9 = vpop.f32.mrb[60].mxu1 }
 0x2c1   : > { %v3754_v14 = vpop.f32.mrb[61].mxu1 }
 0x2c4   : > { %v3756_v15 = vpop.f32.mrb[62].mxu1 }
 0x2c5   : > { %v3758_v13 = vpop.f32.mrb[63].mxu1 }
 0x2db   : > { %v848_v35 = vpop.xlane.xlu0 %847 }
 0x2dc   : > { %v942_v6 = vsub.f32 %v3588_v56, %v848_v35  ;;  %v943_v30 = vsub.f32 %v3590_v58, %v848_v35 }
 0x2de   : > { %v1006_v21 = vmul.f32 1.442695, %v942_v6  ;;  %v1008_v11 = vmul.f32 1.442695, %v943_v30  ;;  %v3803_v6 = vmul.f32 0.25, %v3734_v31 }
 0x2df   : > { %v851_v2 = vpop.xlane.xlu1 %850 }
 0x2e0   : > { %2955 = vpow2.f32 %v1006_v21  ;;  %v944_v48 = vsub.f32 %v3594_v61, %v851_v2  ;;  %v945_v60 = vsub.f32 %v3596_v63, %v851_v2  ;;  %v3783_v63 = vmul.f32 0.25, %v735_v18 }
 0x2e1   : > { %2957 = vpow2.f32 %v1008_v11  ;;  %v3785_v2 = vmul.f32 0.25, %v737_v23  ;;  %v3800_v23 = vmul.f32 0.25, %v3732_v26  ;;  %v3815_v26 = vmul.f32 0.25, %v3738_v40 }
 0x2e2   : > { %v1010_v53 = vmul.f32 1.442695, %v944_v48  ;;  %v1012_v50 = vmul.f32 1.442695, %v945_v60 }
 0x2e3   : > { %v854_v45 = vpop.xlane.xlu1 %853 }
 0x2e4   : > { %2959 = vpow2.f32 %v1010_v53  ;;  %v946_v43 = vsub.f32 %v3600_v3, %v854_v45  ;;  %v947_v41 = vsub.f32 %v3602_v5, %v854_v45 }
 0x2e5   : > { %2961 = vpow2.f32 %v1012_v50 }
 0x2e6   : > { %v1014_v56 = vmul.f32 1.442695, %v946_v43  ;;  %v1016_v58 = vmul.f32 1.442695, %v947_v41 }
 0x2e7   : > { %v857_v35 = vpop.xlane.xlu1 %856 }
 0x2e8   : > { %2963 = vpow2.f32 %v1014_v56  ;;  %v948_v21 = vsub.f32 %v3606_v8, %v857_v35  ;;  %v949_v61 = vsub.f32 %v3608_v10, %v857_v35  ;;  %v918_v10 = vmax.f32 %v3783_v63, %v3785_v2 }
 0x2e9   : > { %2965 = vpow2.f32 %v1016_v58  ;;  %v3812_v58 = vmul.f32 0.25, %v3736_v38 }
 0x2ea   : > { %v3787_v60 = vpop.eup %2955  ;;  %v1018_v53 = vmul.f32 1.442695, %v948_v21  ;;  %v1020_v3 = vmul.f32 1.442695, %v949_v61 }
 0x2eb   : > { %v3789_v11 = vpop.eup %2957  ;;  %v860_v5 = vpop.xlane.xlu0 %859 }
 0x2ec   : > { %2967 = vpow2.f32 %v1018_v53  ;;  %v950_v41 = vsub.f32 %v3612_v17, %v860_v5  ;;  %v951_v45 = vsub.f32 %v3614_v19, %v860_v5  ;;  %v1134_v8 = vadd.f32 %v3789_v11, %v3787_v60 }
 0x2ed   : > { %2969 = vpow2.f32 %v1020_v3  ;;  %v924_v3 = vmax.f32 %v3812_v58, %v3815_v26 }
 0x2ee   : > { %v3797_v50 = vpop.eup %2959  ;;  %v1022_v30 = vmul.f32 1.442695, %v950_v41  ;;  %v1024_v18 = vmul.f32 1.442695, %v951_v45  ;;  %1135 = vadd.xlane.f32.xlu0 %v1134_v8  ;;  %v3832_v8 = vmul.f32 0.25, %v3740_v46  ;;  %v3847_v46 = vmul.f32 0.25, %v3746_v55 }
 0x2ef   : > { %v3805_v17 = vpop.eup %2961  ;;  %v863_v19 = vpop.xlane.xlu1 %862 }
 0x2f0   : > { %2971 = vpow2.f32 %v1022_v30  ;;  %v952_v48 = vsub.f32 %v3618_v22, %v863_v19  ;;  %v953_v43 = vsub.f32 %v3620_v24, %v863_v19  ;;  %v1137_v56 = vadd.f32 %v3805_v17, %v3797_v50 }
 0x2f1   : > { %2973 = vpow2.f32 %v1024_v18  ;;  %v921_v22 = vmax.f32 %v3800_v23, %v3803_v6 }
 0x2f2   : > { %v3817_v31 = vpop.eup %2963  ;;  %v1026_v35 = vmul.f32 1.442695, %v952_v48  ;;  %v1028_v21 = vmul.f32 1.442695, %v953_v43  ;;  %1138 = vadd.xlane.f32.xlu1 %v1137_v56  ;;  %919 = vmax.xlane.f32.xlu0 %v918_v10  ;;  %v3844_v48 = vmul.f32 0.25, %v3744_v1 }
 0x2f3   : > { %v3821_v24 = vpop.eup %2965  ;;  %v866_v61 = vpop.xlane.xlu0 %865 }
 0x2f4   : > { %2975 = vpow2.f32 %v1026_v35  ;;  %v954_v53 = vsub.f32 %v3624_v27, %v866_v61  ;;  %v955_v38 = vsub.f32 %v3626_v29, %v866_v61  ;;  %v1140_v40 = vadd.f32 %v3821_v24, %v3817_v31 }
 0x2f5   : > { %2977 = vpow2.f32 %v1028_v21  ;;  %v3835_v27 = vmul.f32 0.25, %v3742_v51  ;;  %v930_v61 = vmax.f32 %v3844_v48, %v3847_v46 }
 0x2f6   : > { %v3829_v5 = vpop.eup %2967  ;;  %v1030_v41 = vmul.f32 1.442695, %v954_v53  ;;  %v1032_v45 = vmul.f32 1.442695, %v955_v38  ;;  %1141 = vadd.xlane.f32.xlu0 %v1140_v40  ;;  %922 = vmax.xlane.f32.xlu1 %v921_v22  ;;  %v179_v22 = vld [vmem:[%s4884_s1 + $0x48] sm:$0xff] }
 0x2f7   : > { %v3837_v29 = vpop.eup %2969  ;;  %v869_v10 = vpop.xlane.xlu1 %868  ;;  %2693 = vmatmul.mubr.msk.f32.gmra.mrb[18].mxu0 %vm185_vm1, %v179_v22  ;;  %v3901_v22 = vmul.f32 0.25, %v3756_v15 }
 0x2f8   : > { %2979 = vpow2.f32 %v1030_v41  ;;  %v956_v30 = vsub.f32 %v3630_v32, %v869_v10  ;;  %v957_v18 = vsub.f32 %v3632_v34, %v869_v10  ;;  %v1143_v19 = vadd.f32 %v3837_v29, %v3829_v5  ;;  %351 = vmatprep.mubr.f32.mxu0 %v4967_v57 }
 0x2f9   : > { %2981 = vpow2.f32 %v1032_v45  ;;  %v927_v32 = vmax.f32 %v3832_v8, %v3835_v27 }
 0x2fa   : > { %v3849_v51 = vpop.eup %2971  ;;  %v1034_v43 = vmul.f32 1.442695, %v956_v30  ;;  %v1036_v56 = vmul.f32 1.442695, %v957_v18  ;;  %1144 = vadd.xlane.f32.xlu1 %v1143_v19  ;;  %925 = vmax.xlane.f32.xlu0 %v924_v3 }
 0x2fb   : > { %v3853_v34 = vpop.eup %2973  ;;  %v872_v35 = vpop.xlane.xlu0 %871 }
 0x2fc   : > { %2983 = vpow2.f32 %v1034_v43  ;;  %v958_v21 = vsub.f32 %v3636_v37, %v872_v35  ;;  %v959_v1 = vsub.f32 %v3638_v39, %v872_v35  ;;  %v1146_v55 = vadd.f32 %v3853_v34, %v3849_v51 }
 0x2fd   : > { %2985 = vpow2.f32 %v1036_v56  ;;  %v3868_v37 = vmul.f32 0.25, %v3748_v0  ;;  %v3871_v39 = vmul.f32 0.25, %v3750_v16  ;;  %v3881_v0 = vmul.f32 0.25, %v3752_v9 }
 0x2fe   : > { %v3865_v53 = vpop.eup %2975  ;;  %v1038_v38 = vmul.f32 1.442695, %v958_v21  ;;  %v1040_v40 = vmul.f32 1.442695, %v959_v1  ;;  %1147 = vadd.xlane.f32.xlu0 %v1146_v55  ;;  %928 = vmax.xlane.f32.xlu1 %v927_v32  ;;  %v3884_v16 = vmul.f32 0.25, %v3754_v14 }
 0x2ff   : > { %v3873_v3 = vpop.eup %2977  ;;  %v875_v41 = vpop.xlane.xlu1 %874 }
 0x300   : > { %2987 = vpow2.f32 %v1038_v38  ;;  %v960_v45 = vsub.f32 %v3642_v42, %v875_v41  ;;  %v961_v10 = vsub.f32 %v3644_v44, %v875_v41  ;;  %v1149_v30 = vadd.f32 %v3873_v3, %v3865_v53 }
 0x301   : > { %2989 = vpow2.f32 %v1040_v40  ;;  %v933_v42 = vmax.f32 %v3868_v37, %v3871_v39  ;;  %v936_v35 = vmax.f32 %v3881_v0, %v3884_v16 }
 0x302   : > { %v3886_v18 = vpop.eup %2979  ;;  %v1042_v19 = vmul.f32 1.442695, %v960_v45  ;;  %v1044_v43 = vmul.f32 1.442695, %v961_v10  ;;  %1150 = vadd.xlane.f32.xlu1 %v1149_v30  ;;  %931 = vmax.xlane.f32.xlu0 %v930_v61 }
 0x303   : > { %v3890_v44 = vpop.eup %2981  ;;  %v878_v56 = vpop.xlane.xlu0 %877 }
 0x304   : > { %2991 = vpow2.f32 %v1042_v19  ;;  %v962_v32 = vsub.f32 %v3648_v47, %v878_v56  ;;  %v963_v9 = vsub.f32 %v3650_v49, %v878_v56  ;;  %v1152_v14 = vadd.f32 %v3890_v44, %v3886_v18 }
 0x305   : > { %2993 = vpow2.f32 %v1044_v43  ;;  %v3904_v47 = vmul.f32 0.25, %v3758_v13 }
 0x306   : > { %v3898_v21 = vpop.eup %2983  ;;  %v1046_v1 = vmul.f32 1.442695, %v962_v32  ;;  %v1048_v55 = vmul.f32 1.442695, %v963_v9  ;;  %1153 = vadd.xlane.f32.xlu0 %v1152_v14  ;;  %934 = vmax.xlane.f32.xlu1 %v933_v42 }
 0x307   : > { %v3906_v49 = vpop.eup %2985  ;;  %v881_v61 = vpop.xlane.xlu1 %880  ;;  %v939_v13 = vmax.f32 %v3901_v22, %v3904_v47 }
 0x308   : > { %2995 = vpow2.f32 %v1046_v1  ;;  %v964_v38 = vsub.f32 %v3654_v52, %v881_v61  ;;  %v965_v40 = vsub.f32 %v3656_v54, %v881_v61  ;;  %v1155_v41 = vadd.f32 %v3906_v49, %v3898_v21 }
 0x309   : > { %2997 = vpow2.f32 %v1048_v55 }
 0x30a   : > { %v3912_v45 = vpop.eup %2987  ;;  %v1050_v10 = vmul.f32 1.442695, %v964_v38  ;;  %v1052_v15 = vmul.f32 1.442695, %v965_v40  ;;  %1156 = vadd.xlane.f32.xlu1 %v1155_v41  ;;  %937 = vmax.xlane.f32.xlu0 %v936_v35 }
 0x30b   : > { %v3916_v30 = vpop.eup %2989  ;;  %v884_v19 = vpop.xlane.xlu0 %883 }
 0x30c   : > { %2999 = vpow2.f32 %v1050_v10  ;;  %v966_v52 = vsub.f32 %v3660_v59, %v884_v19  ;;  %v967_v54 = vsub.f32 %v3662_v62, %v884_v19  ;;  %v1158_v43 = vadd.f32 %v3916_v30, %v3912_v45 }
 0x30d   : > { %3001 = vpow2.f32 %v1052_v15 }
 0x30e   : > { %v3922_v42 = vpop.eup %2991  ;;  %v1054_v56 = vmul.f32 1.442695, %v966_v52  ;;  %v1056_v32 = vmul.f32 1.442695, %v967_v54  ;;  %1159 = vadd.xlane.f32.xlu0 %v1158_v43  ;;  %940 = vmax.xlane.f32.xlu1 %v939_v13 }
 0x30f   : > { %v3924_v9 = vpop.eup %2993  ;;  %v887_v14 = vpop.xlane.xlu1 %886 }
 0x310   : > { %3003 = vpow2.f32 %v1054_v56  ;;  %v968_v35 = vsub.f32 %v3666_v4, %v887_v14  ;;  %v969_v59 = vsub.f32 %v3668_v7, %v887_v14  ;;  %v1161_v62 = vadd.f32 %v3924_v9, %v3922_v42 }
 0x311   : > { %3005 = vpow2.f32 %v1056_v32 }
 0x312   : > { %v3930_v1 = vpop.eup %2995  ;;  %v1058_v55 = vmul.f32 1.442695, %v968_v35  ;;  %v1060_v61 = vmul.f32 1.442695, %v969_v59  ;;  %1162 = vadd.xlane.f32.xlu1 %v1161_v62 }
 0x313   : > { %v3932_v38 = vpop.eup %2997  ;;  %v890_v40 = vpop.xlane.xlu0 %889 }
 0x314   : > { %3007 = vpow2.f32 %v1058_v55  ;;  %v970_v41 = vsub.f32 %v3672_v12, %v890_v40  ;;  %v971_v10 = vsub.f32 %v3674_v20, %v890_v40  ;;  %v1164_v4 = vadd.f32 %v3932_v38, %v3930_v1 }
 0x315   : > { %3009 = vpow2.f32 %v1060_v61 }
 0x316   : > { %v3938_v7 = vpop.eup %2999  ;;  %v1062_v15 = vmul.f32 1.442695, %v970_v41  ;;  %v1064_v13 = vmul.f32 1.442695, %v971_v10  ;;  %1165 = vadd.xlane.f32.xlu0 %v1164_v4  ;;  %v4968_v10 = vld [vmem:[#allocation9_spill] sm:$0xff] }
 0x317   : > { %v3940_v19 = vpop.eup %3001  ;;  %v893_v52 = vpop.xlane.xlu1 %892 }
 0x318   : > { %3011 = vpow2.f32 %v1062_v15  ;;  %v972_v54 = vsub.f32 %v3678_v25, %v893_v52  ;;  %v973_v43 = vsub.f32 %v3680_v28, %v893_v52  ;;  %v1167_v12 = vadd.f32 %v3940_v19, %v3938_v7  ;;  %v4969_v15 = vld [vmem:[#allocation10_spill] sm:$0xff] }
 0x319   : > { %3013 = vpow2.f32 %v1064_v13 }
 0x31a   : > { %v3946_v20 = vpop.eup %3003  ;;  %v1066_v56 = vmul.f32 1.442695, %v972_v54  ;;  %v1068_v32 = vmul.f32 1.442695, %v973_v43  ;;  %1168 = vadd.xlane.f32.xlu1 %v1167_v12 }
 0x31b   : > { %v3948_v14 = vpop.eup %3005  ;;  %v896_v35 = vpop.xlane.xlu0 %895 }
 0x31c   : > { %3015 = vpow2.f32 %v1066_v56  ;;  %v974_v59 = vsub.f32 %v3684_v33, %v896_v35  ;;  %v975_v62 = vsub.f32 %v3686_v36, %v896_v35  ;;  %v1170_v25 = vadd.f32 %v3948_v14, %v3946_v20  ;;  %v4971_v56 = vld [vmem:[#allocation11_spill] sm:$0xff]  ;;  %v4972_v35 = vld [vmem:[#allocation12_spill] sm:$0xff] }
 0x31d   : > { %3017 = vpow2.f32 %v1068_v32 }
 0x31e   : > { %v3954_v28 = vpop.eup %3007  ;;  %v1070_v55 = vmul.f32 1.442695, %v974_v59  ;;  %v1072_v61 = vmul.f32 1.442695, %v975_v62  ;;  %1171 = vadd.xlane.f32.xlu0 %v1170_v25 }
 0x31f   : > { %v3956_v40 = vpop.eup %3009  ;;  %v899_v41 = vpop.xlane.xlu1 %898 }
 0x320   : > { %3019 = vpow2.f32 %v1070_v55  ;;  %v976_v4 = vsub.f32 %v4968_v10, %v899_v41  ;;  %v977_v13 = vsub.f32 %v4969_v15, %v899_v41  ;;  %v1173_v33 = vadd.f32 %v3956_v40, %v3954_v28 }
 0x321   : > { %3021 = vpow2.f32 %v1072_v61 }
 0x322   : > { %v3962_v36 = vpop.eup %3011  ;;  %v1074_v52 = vmul.f32 1.442695, %v976_v4  ;;  %v1076_v54 = vmul.f32 1.442695, %v977_v13  ;;  %1174 = vadd.xlane.f32.xlu1 %v1173_v33  ;;  %v4974_v4 = vld [vmem:[#allocation13_spill] sm:$0xff]  ;;  %v4975_v13 = vld [vmem:[#allocation14_spill] sm:$0xff] }
 0x323   : > { %4970 = vst [vmem:[#allocation9_spill] sm:$0xff] %v3962_v36  ;;  %v3964_v43 = vpop.eup %3013  ;;  %v902_v12 = vpop.xlane.xlu0 %901 }
 0x324   : > { %3023 = vpow2.f32 %v1074_v52  ;;  %v978_v32 = vsub.f32 %v4971_v56, %v902_v12  ;;  %v979_v59 = vsub.f32 %v4972_v35, %v902_v12  ;;  %v1176_v62 = vadd.f32 %v3964_v43, %v3962_v36 }
 0x325   : > { %3025 = vpow2.f32 %v1076_v54 }
 0x326   : > { %v3970_v25 = vpop.eup %3015  ;;  %v1078_v55 = vmul.f32 1.442695, %v978_v32  ;;  %v1080_v61 = vmul.f32 1.442695, %v979_v59  ;;  %1177 = vadd.xlane.f32.xlu0 %v1176_v62  ;;  %v4978_v59 = vld [vmem:[#allocation15_spill] sm:$0xff] }
 0x327   : > { %4973 = vst [vmem:[#allocation10_spill] sm:$0xff] %v3970_v25  ;;  %v3972_v41 = vpop.eup %3017  ;;  %v905_v10 = vpop.xlane.xlu1 %904 }
 0x328   : > { %3027 = vpow2.f32 %v1078_v55  ;;  %v980_v15 = vsub.f32 %v4974_v4, %v905_v10  ;;  %v981_v33 = vsub.f32 %v4975_v13, %v905_v10  ;;  %v1179_v52 = vadd.f32 %v3972_v41, %v3970_v25  ;;  %v4979_v55 = vld [vmem:[#allocation16_spill] sm:$0xff] }
 0x329   : > { %3029 = vpow2.f32 %v1080_v61 }
 0x32a   : > { %v3978_v12 = vpop.eup %3019  ;;  %v1082_v54 = vmul.f32 1.442695, %v980_v15  ;;  %v1084_v56 = vmul.f32 1.442695, %v981_v33  ;;  %1180 = vadd.xlane.f32.xlu1 %v1179_v52  ;;  %v4982_v52 = vld [vmem:[#allocation17_spill] sm:$0xff] }
 0x32b   : > { %4976 = vst [vmem:[#allocation11_spill] sm:$0xff] %v3978_v12  ;;  %v3980_v32 = vpop.eup %3021  ;;  %v908_v35 = vpop.xlane.xlu0 %907 }
 0x32c   : > { %4977 = vst [vmem:[#allocation12_spill] sm:$0xff] %v3980_v32  ;;  %3031 = vpow2.f32 %v1082_v54  ;;  %v982_v62 = vsub.f32 %v4978_v59, %v908_v35  ;;  %v983_v57 = vsub.f32 %v4979_v55, %v908_v35  ;;  %v1182_v10 = vadd.f32 %v3980_v32, %v3978_v12  ;;  %v4983_v54 = vld [vmem:[#allocation18_spill] sm:$0xff] }
 0x32d   : > { %3033 = vpow2.f32 %v1084_v56 }
 0x32e   : > { %v3986_v4 = vpop.eup %3023  ;;  %v1086_v61 = vmul.f32 1.442695, %v982_v62  ;;  %v1088_v13 = vmul.f32 1.442695, %v983_v57  ;;  %1183 = vadd.xlane.f32.xlu0 %v1182_v10  ;;  %v4984_v10 = vld [vmem:[#allocation19_spill] sm:$0xff] }
 0x32f   : > { %4980 = vst [vmem:[#allocation13_spill] sm:$0xff] %v3986_v4  ;;  %v3988_v15 = vpop.eup %3025  ;;  %v911_v33 = vpop.xlane.xlu1 %910 }
 0x330   : > { %4981 = vst [vmem:[#allocation14_spill] sm:$0xff] %v3988_v15  ;;  %3035 = vpow2.f32 %v1086_v61  ;;  %v984_v36 = vsub.f32 %v4982_v52, %v911_v33  ;;  %v985_v25 = vsub.f32 %v4983_v54, %v911_v33  ;;  %v1185_v35 = vadd.f32 %v3988_v15, %v3986_v4  ;;  %v4985_v61 = vld [vmem:[#allocation20_spill] sm:$0xff] }
 0x331   : > { %3037 = vpow2.f32 %v1088_v13 }
 0x332   : > { %v3994_v59 = vpop.eup %3027  ;;  %v1090_v56 = vmul.f32 1.442695, %v984_v36  ;;  %v1092_v55 = vmul.f32 1.442695, %v985_v25  ;;  %1186 = vadd.xlane.f32.xlu1 %v1185_v35  ;;  %v4986_v35 = vld [vmem:[#allocation21_spill] sm:$0xff] }
 0x333   : > { %v3996_v62 = vpop.eup %3029  ;;  %v914_v57 = vpop.xlane.xlu0 %913 }
 0x334   : > { %3039 = vpow2.f32 %v1090_v56  ;;  %v986_v12 = vsub.f32 %v4984_v10, %v914_v57  ;;  %v987_v32 = vsub.f32 %v4985_v61, %v914_v57  ;;  %v1188_v33 = vadd.f32 %v3996_v62, %v3994_v59  ;;  %v4987_v56 = vld [vmem:[#allocation22_spill] sm:$0xff] }
 0x335   : > { %3041 = vpow2.f32 %v1092_v55 }
 0x336   : > { %v4002_v52 = vpop.eup %3031  ;;  %v1094_v13 = vmul.f32 1.442695, %v986_v12  ;;  %v1096_v54 = vmul.f32 1.442695, %v987_v32  ;;  %1189 = vadd.xlane.f32.xlu0 %v1188_v33 }
 0x337   : > { %v4004_v36 = vpop.eup %3033  ;;  %v917_v25 = vpop.xlane.xlu1 %916 }
 0x338   : > { %3043 = vpow2.f32 %v1094_v13  ;;  %v988_v4 = vsub.f32 %v4986_v35, %v917_v25  ;;  %v989_v15 = vsub.f32 %v4987_v56, %v917_v25  ;;  %v1191_v57 = vadd.f32 %v4004_v36, %v4002_v52 }
 0x339   : > { %3045 = vpow2.f32 %v1096_v54 }
 0x33a   : > { %v4010_v10 = vpop.eup %3035  ;;  %v1098_v55 = vmul.f32 1.442695, %v988_v4  ;;  %v1100_v61 = vmul.f32 1.442695, %v989_v15  ;;  %1192 = vadd.xlane.f32.xlu1 %v1191_v57 }
 0x33b   : > { %4988 = vst [vmem:[#allocation15_spill] sm:$0xff] %v4010_v10  ;;  %v4012_v12 = vpop.eup %3037 }
 0x33c   : > { %4989 = vst [vmem:[#allocation16_spill] sm:$0xff] %v4012_v12  ;;  %3047 = vpow2.f32 %v1098_v55  ;;  %v1194_v32 = vadd.f32 %v4012_v12, %v4010_v10 }
 0x33d   : > { %3049 = vpow2.f32 %v1100_v61 }
 0x33e   : > { %v4016_v33 = vpop.eup %3039  ;;  %1195 = vadd.xlane.f32.xlu0 %v1194_v32 }
 0x33f   : > { %4990 = vst [vmem:[#allocation17_spill] sm:$0xff] %v4016_v33  ;;  %v4018_v13 = vpop.eup %3041 }
 0x340   : > { %4991 = vst [vmem:[#allocation18_spill] sm:$0xff] %v4018_v13  ;;  %v1197_v54 = vadd.f32 %v4018_v13, %v4016_v33 }
 0x342   : > { %v4022_v25 = vpop.eup %3043  ;;  %1198 = vadd.xlane.f32.xlu1 %v1197_v54 }
 0x343   : > { %4992 = vst [vmem:[#allocation19_spill] sm:$0xff] %v4022_v25  ;;  %v4024_v4 = vpop.eup %3045 }
 0x344   : > { %4993 = vst [vmem:[#allocation20_spill] sm:$0xff] %v4024_v4  ;;  %v1200_v15 = vadd.f32 %v4024_v4, %v4022_v25 }
 0x346   : > { %v4028_v35 = vpop.eup %3047  ;;  %1201 = vadd.xlane.f32.xlu0 %v1200_v15 }
 0x347   : > { %4994 = vst [vmem:[#allocation21_spill] sm:$0xff] %v4028_v35  ;;  %v4030_v56 = vpop.eup %3049 }
 0x348   : > { %4995 = vst [vmem:[#allocation22_spill] sm:$0xff] %v4030_v56  ;;  %v1203_v57 = vadd.f32 %v4030_v56, %v4028_v35 }
 0x34a   : > { %1204 = vadd.xlane.f32.xlu1 %v1203_v57 }
 0x37b   : > { %v1136_v55 = vpop.xlane.xlu0 %1135 }
 0x37c   : > { %3051 = vrcp.f32 %v1136_v55 }
 0x37f   : > { %v1139_v61 = vpop.xlane.xlu1 %1138  ;;  %v920_v32 = vpop.xlane.xlu0 %919 }
 0x380   : > { %3053 = vrcp.f32 %v1139_v61  ;;  %v990_v54 = vsub.f32 %v3783_v63, %v920_v32  ;;  %v991_v10 = vsub.f32 %v3785_v2, %v920_v32 }
 0x382   : > { %v1102_v33 = vmul.f32 1.442695, %v990_v54  ;;  %v1104_v25 = vmul.f32 1.442695, %v991_v10 }
 0x383   : > { %v1142_v4 = vpop.xlane.xlu0 %1141  ;;  %v923_v13 = vpop.xlane.xlu1 %922 }
 0x384   : > { %3055 = vpow2.f32 %v1102_v33  ;;  %v992_v15 = vsub.f32 %v3800_v23, %v923_v13  ;;  %v993_v12 = vsub.f32 %v3803_v6, %v923_v13 }
 0x385   : > { %3057 = vpow2.f32 %v1104_v25 }
 0x386   : > { %3059 = vrcp.f32 %v1142_v4  ;;  %v1106_v57 = vmul.f32 1.442695, %v992_v15  ;;  %v1108_v55 = vmul.f32 1.442695, %v993_v12  ;;  %v3052_v61 = vpop.eup %3051 }
 0x387   : > { %v1145_v35 = vpop.xlane.xlu1 %1144  ;;  %v926_v56 = vpop.xlane.xlu0 %925  ;;  %v1232_v6 = vmul.f32 %v3052_v61, %v3789_v11  ;;  %v1231_v12 = vmul.f32 %v3052_v61, %v3787_v60 }
 0x388   : > { %3061 = vpow2.f32 %v1106_v57  ;;  %v994_v63 = vsub.f32 %v3812_v58, %v926_v56  ;;  %v995_v2 = vsub.f32 %v3815_v26, %v926_v56 }
 0x389   : > { %3063 = vpow2.f32 %v1108_v55 }
 0x38a   : > { %v3054_v10 = vpop.eup %3053  ;;  %3065 = vrcp.f32 %v1145_v35  ;;  %v1110_v33 = vmul.f32 1.442695, %v994_v63  ;;  %v1112_v32 = vmul.f32 1.442695, %v995_v2 }
 0x38b   : > { %v1148_v23 = vpop.xlane.xlu0 %1147  ;;  %v929_v54 = vpop.xlane.xlu1 %928  ;;  %v1235_v13 = vmul.f32 %v3054_v10, %v3805_v17  ;;  %v1234_v25 = vmul.f32 %v3054_v10, %v3797_v50 }
 0x38c   : > { %3067 = vpow2.f32 %v1110_v33  ;;  %v996_v58 = vsub.f32 %v3832_v8, %v929_v54  ;;  %v997_v26 = vsub.f32 %v3835_v27, %v929_v54 }
 0x38d   : > { %3069 = vpow2.f32 %v1112_v32  ;;  %v2773_v4 = vpack.c.bf16 %v1235_v13, %v1232_v6  ;;  %v2775_v35 = vpack.c.bf16 %v1234_v25, %v1231_v12 }
 0x38e   : > { %v4046_v56 = vpop.eup %3055  ;;  %3071 = vrcp.f32 %v1148_v23  ;;  %v1114_v15 = vmul.f32 1.442695, %v996_v58  ;;  %v1116_v57 = vmul.f32 1.442695, %v997_v26 }
 0x38f   : > { %v4048_v11 = vpop.eup %3057  ;;  %2774 = vmatprep.subr.bf16.mxu0 %v2773_v4  ;;  %v1151_v17 = vpop.xlane.xlu1 %1150 }
 0x390   : > { %v932_v60 = vpop.xlane.xlu0 %931  ;;  %v3060_v55 = vpop.eup %3059  ;;  %3073 = vpow2.f32 %v1114_v15  ;;  %2776 = vmatpush1.bf16.xpose.msra.mxu0 %v2775_v35  ;;  %v1206_v27 = vadd.f32 %v4048_v11, %v4046_v56 }
 0x391   : > { %v998_v50 = vsub.f32 %v3844_v48, %v932_v60  ;;  %v999_v8 = vsub.f32 %v3847_v46, %v932_v60  ;;  %3075 = vpow2.f32 %v1116_v57  ;;  %v1238_v23 = vmul.f32 %v3060_v55, %v3821_v24 }
 0x392   : > { %v4054_v61 = vpop.eup %3061  ;;  %3077 = vrcp.f32 %v1151_v17  ;;  %1207 = vadd.xlane.f32.xlu0 %v1206_v27  ;;  %v1237_v12 = vmul.f32 %v3060_v55, %v3817_v31 }
 0x393   : > { %v1118_v63 = vmul.f32 1.442695, %v998_v50  ;;  %v1120_v2 = vmul.f32 1.442695, %v999_v8  ;;  %v4056_v10 = vpop.eup %3063  ;;  %v935_v32 = vpop.xlane.xlu1 %934 }
 0x394   : > { %v1154_v33 = vpop.xlane.xlu0 %1153  ;;  %v3066_v48 = vpop.eup %3065  ;;  %v1000_v46 = vsub.f32 %v3868_v37, %v935_v32  ;;  %v1001_v54 = vsub.f32 %v3871_v39, %v935_v32  ;;  %v1209_v6 = vadd.f32 %v4056_v10, %v4054_v61 }
 0x395   : > { %3079 = vpow2.f32 %v1118_v63  ;;  %v1241_v13 = vmul.f32 %v3066_v48, %v3837_v29  ;;  %v1240_v25 = vmul.f32 %v3066_v48, %v3829_v5 }
 0x396   : > { %3081 = vpow2.f32 %v1120_v2  ;;  %v4066_v58 = vpop.eup %3067  ;;  %v1122_v26 = vmul.f32 1.442695, %v1000_v46  ;;  %v1124_v24 = vmul.f32 1.442695, %v1001_v54  ;;  %1210 = vadd.xlane.f32.xlu1 %v1209_v6 }
 0x397   : > { %v4068_v4 = vpop.eup %3069  ;;  %3083 = vrcp.f32 %v1154_v33  ;;  %v2777_v37 = vpack.c.bf16 %v1241_v13, %v1238_v23  ;;  %v1157_v39 = vpop.xlane.xlu1 %1156  ;;  %v2779_v15 = vpack.c.bf16 %v1240_v25, %v1237_v12 }
 0x398   : > { %v938_v35 = vpop.xlane.xlu0 %937  ;;  %v3072_v57 = vpop.eup %3071  ;;  %3085 = vpow2.f32 %v1122_v26  ;;  %v1212_v5 = vadd.f32 %v4068_v4, %v4066_v58 }
 0x399   : > { %v1002_v29 = vsub.f32 %v3881_v0, %v938_v35  ;;  %v1003_v31 = vsub.f32 %v3884_v16, %v938_v35  ;;  %3087 = vpow2.f32 %v1124_v24  ;;  %2778 = vmatprep.subr.bf16.mxu0 %v2777_v37  ;;  %v1244_v27 = vmul.f32 %v3072_v57, %v3853_v34 }
 0x39a   : > { %v4074_v17 = vpop.eup %3073  ;;  %3089 = vrcp.f32 %v1157_v39  ;;  %2780 = vmatpush1.bf16.xpose.msra.mxu0 %v2779_v15  ;;  %1213 = vadd.xlane.f32.xlu0 %v1212_v5  ;;  %v1243_v23 = vmul.f32 %v3072_v57, %v3849_v51 }
 0x39b   : > { %v1126_v60 = vmul.f32 1.442695, %v1002_v29  ;;  %v1128_v55 = vmul.f32 1.442695, %v1003_v31  ;;  %v4076_v50 = vpop.eup %3075  ;;  %v941_v8 = vpop.xlane.xlu1 %940 }
 0x39c   : > { %v3078_v0 = vpop.eup %3077  ;;  %v1160_v16 = vpop.xlane.xlu0 %1159  ;;  %v1004_v63 = vsub.f32 %v3901_v22, %v941_v8  ;;  %v1005_v2 = vsub.f32 %v3904_v47, %v941_v8  ;;  %v1215_v33 = vadd.f32 %v4076_v50, %v4074_v17 }
 0x39d   : > { %3091 = vpow2.f32 %v1126_v60  ;;  %v1247_v32 = vmul.f32 %v3078_v0, %v3873_v3  ;;  %v1246_v48 = vmul.f32 %v3078_v0, %v3865_v53 }
 0x39e   : > { %3093 = vpow2.f32 %v1128_v55  ;;  %v1130_v34 = vmul.f32 1.442695, %v1004_v63  ;;  %v1132_v54 = vmul.f32 1.442695, %v1005_v2  ;;  %1216 = vadd.xlane.f32.xlu1 %v1215_v33 }
 0x39f   : > { %v4086_v46 = vpop.eup %3079  ;;  %3095 = vrcp.f32 %v1160_v16  ;;  %v2781_v22 = vpack.c.bf16 %v1247_v32, %v1244_v27  ;;  %v1163_v47 = vpop.xlane.xlu1 %1162  ;;  %v2783_v13 = vpack.c.bf16 %v1246_v48, %v1243_v23 }
 0x3a0   : > { %v4088_v6 = vpop.eup %3081  ;;  %3097 = vpow2.f32 %v1130_v34 }
 0x3a1   : > { %v1218_v12 = vadd.f32 %v4088_v6, %v4086_v46  ;;  %v3084_v3 = vpop.eup %3083  ;;  %3099 = vpow2.f32 %v1132_v54  ;;  %2782 = vmatprep.subr.bf16.mxu0 %v2781_v22 }
 0x3a2   : > { %v4092_v51 = vpop.eup %3085  ;;  %3101 = vrcp.f32 %v1163_v47  ;;  %2784 = vmatpush1.bf16.xpose.msra.mxu0 %v2783_v13  ;;  %v1250_v37 = vmul.f32 %v3084_v3, %v3890_v44  ;;  %v1249_v35 = vmul.f32 %v3084_v3, %v3886_v18 }
 0x3a3   : > { %1219 = vadd.xlane.f32.xlu0 %v1218_v12  ;;  %v4094_v53 = vpop.eup %3087  ;;  %v1166_v25 = vpop.xlane.xlu0 %1165 }
 0x3a4   : > { %v3090_v26 = vpop.eup %3089  ;;  %v1221_v24 = vadd.f32 %v4094_v53, %v4092_v51  ;;  %3103 = vrcp.f32 %v1166_v25 }
 0x3a5   : > { %v1253_v39 = vmul.f32 %v3090_v26, %v3906_v49  ;;  %v1252_v15 = vmul.f32 %v3090_v26, %v3898_v21 }
 0x3a6   : > { %1222 = vadd.xlane.f32.xlu1 %v1221_v24 }
 0x3a7   : > { %v4102_v57 = vpop.eup %3091  ;;  %v2785_v31 = vpack.c.bf16 %v1253_v39, %v1250_v37  ;;  %v1169_v5 = vpop.xlane.xlu1 %1168  ;;  %v2787_v60 = vpack.c.bf16 %v1252_v15, %v1249_v35 }
 0x3a8   : > { %v4104_v29 = vpop.eup %3093  ;;  %3105 = vrcp.f32 %v1169_v5  ;;  %v4996_v5 = vld [vmem:[#allocation10_spill] sm:$0xff] }
 0x3a9   : > { %v1224_v55 = vadd.f32 %v4104_v29, %v4102_v57  ;;  %v3096_v44 = vpop.eup %3095  ;;  %2786 = vmatprep.subr.bf16.mxu0 %v2785_v31 }
 0x3aa   : > { %v4108_v49 = vpop.eup %3097  ;;  %2788 = vmatpush1.bf16.xpose.msra.mxu0 %v2787_v60  ;;  %v1256_v0 = vmul.f32 %v3096_v44, %v3916_v30  ;;  %v1255_v63 = vmul.f32 %v3096_v44, %v3912_v45  ;;  %v4997_v60 = vld [vmem:[#allocation9_spill] sm:$0xff] }
 0x3ab   : > { %1225 = vadd.xlane.f32.xlu0 %v1224_v55  ;;  %v4110_v18 = vpop.eup %3099  ;;  %v1172_v21 = vpop.xlane.xlu0 %1171 }
 0x3ac   : > { %v3102_v8 = vpop.eup %3101  ;;  %v1227_v27 = vadd.f32 %v4110_v18, %v4108_v49  ;;  %3107 = vrcp.f32 %v1172_v21  ;;  %v4130_v55 = vpop.f32.mrb[12].mxu0 }
 0x3ad   : > { %v1259_v16 = vmul.f32 %v3102_v8, %v3924_v9  ;;  %v1258_v2 = vmul.f32 %v3102_v8, %v3922_v42  ;;  %v4135_v21 = vpop.f32.mrb[13].mxu0 }
 0x3ae   : > { %1228 = vadd.xlane.f32.xlu1 %v1227_v27  ;;  %v3104_v48 = vpop.eup %3103 }
 0x3af   : > { %v2789_v33 = vpack.c.bf16 %v1259_v16, %v1256_v0  ;;  %v1175_v32 = vpop.xlane.xlu1 %1174  ;;  %v2791_v23 = vpack.c.bf16 %v1258_v2, %v1255_v63  ;;  %v1262_v22 = vmul.f32 %v3104_v48, %v3932_v38  ;;  %v1261_v45 = vmul.f32 %v3104_v48, %v3930_v1 }
 0x3b0   : > { %3109 = vrcp.f32 %v1175_v32 }
 0x3b1   : > { %2790 = vmatprep.subr.bf16.mxu0 %v2789_v33 }
 0x3b2   : > { %v3106_v34 = vpop.eup %3105  ;;  %2792 = vmatpush1.bf16.xpose.msra.mxu0 %v2791_v23  ;;  %v4999_v23 = vld [vmem:[#allocation12_spill] sm:$0xff] }
 0x3b3   : > { %v1178_v54 = vpop.xlane.xlu0 %1177  ;;  %v1265_v30 = vmul.f32 %v3106_v34, %v3940_v19  ;;  %v1264_v9 = vmul.f32 %v3106_v34, %v3938_v7  ;;  %v5000_v34 = vld [vmem:[#allocation14_spill] sm:$0xff] }
 0x3b4   : > { %3111 = vrcp.f32 %v1178_v54 }
 0x3b5   : > { %v2793_v42 = vpack.c.bf16 %v1265_v30, %v1262_v22  ;;  %v2795_v47 = vpack.c.bf16 %v1264_v9, %v1261_v45  ;;  %v5001_v22 = vld [vmem:[#allocation13_spill] sm:$0xff]  ;;  %v5002_v9 = vld [vmem:[#allocation11_spill] sm:$0xff] }
 0x3b6   : > { %v3108_v12 = vpop.eup %3107 }
 0x3b7   : > { %2794 = vmatprep.subr.bf16.mxu0 %v2793_v42  ;;  %v1181_v13 = vpop.xlane.xlu1 %1180  ;;  %v1268_v26 = vmul.f32 %v3108_v12, %v3948_v14  ;;  %v1267_v7 = vmul.f32 %v3108_v12, %v3946_v20  ;;  %v180_v20 = vld [vmem:[%s4884_s1 + $0x50] sm:$0xff]  ;;  %v181_v42 = vld [vmem:[%s4884_s1 + $0x58] sm:$0xff] }
 0x3b8   : > { %3113 = vrcp.f32 %v1181_v13  ;;  %2694 = vmatmul.mubr.msk.f32.gmra.mrb[20].mxu0 %vm185_vm1, %v180_v20 }
 0x3ba   : > { %v3110_v3 = vpop.eup %3109  ;;  %2796 = vmatpush1.bf16.xpose.msra.mxu0 %v2795_v47 }
 0x3bb   : > { %v1184_v25 = vpop.xlane.xlu0 %1183  ;;  %v1271_v38 = vmul.f32 %v3110_v3, %v3956_v40  ;;  %v1270_v19 = vmul.f32 %v3110_v3, %v3954_v28 }
 0x3bc   : > { %3115 = vrcp.f32 %v1184_v25 }
 0x3bd   : > { %v2797_v24 = vpack.c.bf16 %v1271_v38, %v1268_v26  ;;  %v2799_v1 = vpack.c.bf16 %v1270_v19, %v1267_v7 }
 0x3be   : > { %v3112_v39 = vpop.eup %3111 }
 0x3bf   : > { %2798 = vmatprep.subr.bf16.mxu0 %v2797_v24  ;;  %v1187_v37 = vpop.xlane.xlu1 %1186  ;;  %v1274_v31 = vmul.f32 %v3112_v39, %v3964_v43  ;;  %v1273_v28 = vmul.f32 %v3112_v39, %v4997_v60  ;;  %v4138_v43 = vpop.f32.mrb[14].mxu0 }
 0x3c0   : > { %3117 = vrcp.f32 %v1187_v37  ;;  %v2843_v0 = vpack.c.bf16 %v4138_v43, %v4130_v55  ;;  %v4143_v16 = vpop.f32.mrb[15].mxu0 }
 0x3c1   : > { %v2841_v2 = vpack.c.bf16 %v4143_v16, %v4135_v21  ;;  %v4154_v47 = vpop.f32.mrb[16].mxu0 }
 0x3c2   : > { %v3114_v35 = vpop.eup %3113  ;;  %2800 = vmatpush1.bf16.xpose.msra.mxu0 %v2799_v1  ;;  %v343_v12 = vpop.f32.mrb[17].mxu0 }
 0x3c3   : > { %v1190_v15 = vpop.xlane.xlu0 %1189  ;;  %v1277_v14 = vmul.f32 %v3114_v35, %v3972_v41  ;;  %v1276_v40 = vmul.f32 %v3114_v35, %v4996_v5  ;;  %v4998_v41 = vmov 0.0  }
 0x3c4   : > { %3119 = vrcp.f32 %v1190_v15  ;;  %357 = vmatprep.mubr.f32.mxu0 %v4998_v41 }
 0x3c5   : > { %v2801_v44 = vpack.c.bf16 %v1277_v14, %v1274_v31  ;;  %v2803_v8 = vpack.c.bf16 %v1276_v40, %v1273_v28  ;;  %2695 = vmatmul.mubr.msk.f32.gmra.mrb[22].mxu0 %vm185_vm1, %v181_v42  ;;  %v5003_v14 = vld [vmem:[#allocation5_spill] sm:$0xff]  ;;  %v5013_v42 = vld [vmem:[#allocation19_spill] sm:$0xff] }
 0x3c6   : > { %v3116_v63 = vpop.eup %3115  ;;  %1390 = vmatprep.mubr.f32.mxu0 %v343_v12  ;;  %v5014_v12 = vld [vmem:[#allocation8_spill] sm:$0xff] }
 0x3c7   : > { %2802 = vmatprep.subr.bf16.mxu0 %v2801_v44  ;;  %v1193_v27 = vpop.xlane.xlu1 %1192  ;;  %v1280_v48 = vmul.f32 %v3116_v63, %v4999_v23  ;;  %v1279_v45 = vmul.f32 %v3116_v63, %v5002_v9  ;;  %v5007_v44 = vld [vmem:[#allocation17_spill] sm:$0xff]  ;;  %v5009_v23 = vld [vmem:[#allocation6_spill] sm:$0xff] }
 0x3c8   : > { %3121 = vrcp.f32 %v1193_v27  ;;  %v5012_v9 = vld [vmem:[#allocation21_spill] sm:$0xff] }
 0x3ca   : > { %v3118_v33 = vpop.eup %3117  ;;  %2804 = vmatpush1.bf16.xpose.msra.mxu0 %v2803_v8  ;;  %v4157_v38 = vpop.f32.mrb[18].mxu0 }
 0x3cb   : > { %v1196_v32 = vpop.xlane.xlu0 %1195  ;;  %v1283_v54 = vmul.f32 %v3118_v33, %v5000_v34  ;;  %v1282_v30 = vmul.f32 %v3118_v33, %v5001_v22  ;;  %v4162_v39 = vpop.f32.mrb[19].mxu0  ;;  %v5010_v34 = vld [vmem:[#allocation20_spill] sm:$0xff]  ;;  %v5011_v22 = vld [vmem:[#allocation22_spill] sm:$0xff] }
 0x3cc   : > { %3123 = vrcp.f32 %v1196_v32 }
 0x3cd   : > { %v2805_v13 = vpack.c.bf16 %v1283_v54, %v1280_v48  ;;  %v2807_v3 = vpack.c.bf16 %v1282_v30, %v1279_v45 }
 0x3ce   : > { %v3120_v26 = vpop.eup %3119 }
 0x3cf   : > { %2806 = vmatprep.subr.bf16.mxu0 %v2805_v13  ;;  %v1199_v25 = vpop.xlane.xlu1 %1198  ;;  %v1286_v24 = vmul.f32 %v3120_v26, %v3996_v62  ;;  %v1285_v35 = vmul.f32 %v3120_v26, %v3994_v59  ;;  %v5004_v62 = vld [vmem:[#allocation7_spill] sm:$0xff] }
 0x3d0   : > { %3125 = vrcp.f32 %v1199_v25  ;;  %v5008_v59 = vld [vmem:[#allocation15_spill] sm:$0xff] }
 0x3d2   : > { %v3122_v19 = vpop.eup %3121  ;;  %2808 = vmatpush1.bf16.xpose.msra.mxu0 %v2807_v3 }
 0x3d3   : > { %v1202_v7 = vpop.xlane.xlu0 %1201  ;;  %v1289_v1 = vmul.f32 %v3122_v19, %v4004_v36  ;;  %v1288_v37 = vmul.f32 %v3122_v19, %v4002_v52  ;;  %v5005_v36 = vld [vmem:[#allocation16_spill] sm:$0xff]  ;;  %v5006_v52 = vld [vmem:[#allocation18_spill] sm:$0xff] }
 0x3d4   : > { %3127 = vrcp.f32 %v1202_v7 }
 0x3d5   : > { %v2809_v15 = vpack.c.bf16 %v1289_v1, %v1286_v24  ;;  %v2811_v31 = vpack.c.bf16 %v1288_v37, %v1285_v35 }
 0x3d6   : > { %v3124_v40 = vpop.eup %3123 }
 0x3d7   : > { %2810 = vmatprep.subr.bf16.mxu0 %v2809_v15  ;;  %v1205_v5 = vpop.xlane.xlu1 %1204  ;;  %v1292_v28 = vmul.f32 %v3124_v40, %v5005_v36  ;;  %v1291_v27 = vmul.f32 %v3124_v40, %v5008_v59 }
 0x3d8   : > { %1482 = vxpose.xlu0.b32.start [1/2] (short) %v5003_v14, 128  ;;  %3129 = vrcp.f32 %v1205_v5 }
 0x3da   : > { %v3126_v60 = vpop.eup %3125  ;;  %2812 = vmatpush1.bf16.xpose.msra.mxu0 %v2811_v31 }
 0x3db   : > { %v1295_v20 = vmul.f32 %v3126_v60, %v5006_v52  ;;  %v1294_v8 = vmul.f32 %v3126_v60, %v5007_v44 }
 0x3dc   : > { %1483 = vxpose.xlu0.b32.end [2/2] (short) %v5004_v62, 128 }
 0x3dd   : > { %v2813_v63 = vpack.c.bf16 %v1295_v20, %v1292_v28  ;;  %v2815_v33 = vpack.c.bf16 %v1294_v8, %v1291_v27 }
 0x3de   : > { %v3128_v32 = vpop.eup %3127 }
 0x3df   : > { %2814 = vmatprep.subr.bf16.mxu0 %v2813_v63  ;;  %v1298_v54 = vmul.f32 %v3128_v32, %v5010_v34  ;;  %v1297_v13 = vmul.f32 %v3128_v32, %v5013_v42 }
 0x3e1   : > { %1514 = vxpose.xlu1.b32.start [1/2] (short) %v5009_v23, 128 }
 0x3e2   : > { %v3130_v48 = vpop.eup %3129  ;;  %2816 = vmatpush1.bf16.xpose.msra.mxu0 %v2815_v33 }
 0x3e3   : > { %v1301_v30 = vmul.f32 %v3130_v48, %v5011_v22  ;;  %v1300_v45 = vmul.f32 %v3130_v48, %v5012_v9 }
 0x3e5   : > { %1515 = vxpose.xlu1.b32.end [2/2] (short) %v5014_v12, 128  ;;  %v2817_v3 = vpack.c.bf16 %v1301_v30, %v1298_v54  ;;  %v2819_v25 = vpack.c.bf16 %v1300_v45, %v1297_v13 }
 0x3e7   : > { %2818 = vmatprep.subr.bf16.mxu0 %v2817_v3 }
 0x3ea   : > { %2820 = vmatpush1.bf16.xpose.msra.mxu0 %v2819_v25 }
 0x41f   : > { %v1208_v26 = vpop.xlane.xlu0 %1207 }
 0x420   : > { %3131 = vrcp.f32 %v1208_v26 }
 0x423   : > { %v1211_v19 = vpop.xlane.xlu1 %1210 }
 0x424   : > { %3133 = vrcp.f32 %v1211_v19 }
 0x427   : > { %v1214_v7 = vpop.xlane.xlu0 %1213 }
 0x428   : > { %3135 = vrcp.f32 %v1214_v7 }
 0x42a   : > { %v3132_v1 = vpop.eup %3131 }
 0x42b   : > { %v1217_v24 = vpop.xlane.xlu1 %1216  ;;  %v1304_v15 = vmul.f32 %v3132_v1, %v4048_v11  ;;  %v1303_v14 = vmul.f32 %v3132_v1, %v4046_v56 }
 0x42c   : > { %3137 = vrcp.f32 %v1217_v24 }
 0x42e   : > { %v3134_v37 = vpop.eup %3133 }
 0x42f   : > { %v1307_v31 = vmul.f32 %v3134_v37, %v4056_v10  ;;  %v1306_v5 = vmul.f32 %v3134_v37, %v4054_v61 }
 0x430   : > { %v1220_v35 = vpop.xlane.xlu0 %1219 }
 0x431   : > { %v2821_v40 = vpack.c.bf16 %v1307_v31, %v1304_v15  ;;  %v2823_v60 = vpack.c.bf16 %v1306_v5, %v1303_v14  ;;  %3139 = vrcp.f32 %v1220_v35 }
 0x432   : > { %v3136_v36 = vpop.eup %3135 }
 0x433   : > { %2822 = vmatprep.subr.bf16.mxu0 %v2821_v40  ;;  %v1223_v62 = vpop.xlane.xlu1 %1222  ;;  %v1310_v20 = vmul.f32 %v3136_v36, %v4068_v4  ;;  %v1309_v10 = vmul.f32 %v3136_v36, %v4066_v58 }
 0x434   : > { %3141 = vrcp.f32 %v1223_v62  ;;  %2824 = vmatpush1.bf16.xpose.msra.mxu0 %v2823_v60 }
 0x436   : > { %v3138_v28 = vpop.eup %3137 }
 0x437   : > { %v1313_v11 = vmul.f32 %v3138_v28, %v4076_v50  ;;  %v1312_v56 = vmul.f32 %v3138_v28, %v4074_v17 }
 0x438   : > { %v1226_v52 = vpop.xlane.xlu0 %1225 }
 0x439   : > { %v2825_v44 = vpack.c.bf16 %v1313_v11, %v1310_v20  ;;  %v2827_v61 = vpack.c.bf16 %v1312_v56, %v1309_v10  ;;  %3143 = vrcp.f32 %v1226_v52 }
 0x43b   : > { %2826 = vmatprep.subr.bf16.mxu0 %v2825_v44  ;;  %v1229_v8 = vpop.xlane.xlu1 %1228  ;;  %v3140_v59 = vpop.eup %3139 }
 0x43c   : > { %3145 = vrcp.f32 %v1229_v8  ;;  %2828 = vmatpush1.bf16.xpose.msra.mxu0 %v2827_v61  ;;  %v1316_v63 = vmul.f32 %v3140_v59, %v4088_v6  ;;  %v1315_v4 = vmul.f32 %v3140_v59, %v4086_v46 }
 0x43e   : > { %v3142_v27 = vpop.eup %3141 }
 0x43f   : > { %v1319_v33 = vmul.f32 %v3142_v27, %v4094_v53  ;;  %v1318_v50 = vmul.f32 %v3142_v27, %v4092_v51 }
 0x441   : > { %v2829_v58 = vpack.c.bf16 %v1319_v33, %v1316_v63  ;;  %v2831_v32 = vpack.c.bf16 %v1318_v50, %v1315_v4 }
 0x443   : > { %2830 = vmatprep.subr.bf16.mxu0 %v2829_v58  ;;  %v3144_v17 = vpop.eup %3143 }
 0x444   : > { %2832 = vmatpush1.bf16.xpose.msra.mxu0 %v2831_v32  ;;  %v1322_v48 = vmul.f32 %v3144_v17, %v4104_v29  ;;  %v1321_v54 = vmul.f32 %v3144_v17, %v4102_v57 }
 0x446   : > { %v3146_v23 = vpop.eup %3145 }
 0x447   : > { %v1325_v34 = vmul.f32 %v3146_v23, %v4110_v18  ;;  %v1324_v6 = vmul.f32 %v3146_v23, %v4108_v49 }
 0x449   : > { %v2833_v22 = vpack.c.bf16 %v1325_v34, %v1322_v48  ;;  %v2835_v53 = vpack.c.bf16 %v1324_v6, %v1321_v54 }
 0x44b   : > { %2834 = vmatprep.subr.bf16.mxu0 %v2833_v22 }
 0x44c   : > { %2836 = vmatpush1.bf16.xpose.msra.mxu0 %v2835_v53 }
 0x453   : > { %1391 = vmatmul.mubr.f32.vlgmr.msra.gmra.mrb[24].mxu0 %v4154_v47 }
 0x454   : > { %1396 = vmatprep.mubr.f32.mxu0 %v4162_v39 }
 0x457   : > { %1397 = vmatmul.mubr.f32.gmra.mrb[26].mxu0 %v4157_v38  ;;  %v182_v38 = vld [vmem:[%s4885_s2] sm:$0xf] }
 0x458   : > { %v1498_v57 = vpop.trf.xlu0 }
 0x45c   : > { %v1499_v49 = vpop.trf.xlu0 }
 0x460   : > { %v1500_v30 = vpop.trf.xlu0 }
 0x464   : > { %v1501_v42 = vpop.trf.xlu0 }
 0x468   : > { %v1502_v3 = vpop.trf.xlu0 }
 0x46c   : > { %v1503_v25 = vpop.trf.xlu0 }
 0x470   : > { %v1504_v26 = vpop.trf.xlu0 }
 0x474   : > { %v1505_v21 = vpop.trf.xlu0 }
 0x478   : > { %v1506_v55 = vpop.trf.xlu0 }
 0x47c   : > { %v1507_v43 = vpop.trf.xlu0 }
 0x48b   : > { %v4196_v46 = vpop.f32.mrb[20].mxu0 }
 0x48c   : > { %5015 = vst [vmem:[#allocation10_spill] sm:$0xff] %v4196_v46  ;;  %v355_v51 = vpop.f32.mrb[21].mxu0 }
 0x48d   : > { %2507 = vmatprep.mubr.f32.mxu0 %v355_v51 }
 0x498   : > { %v4198_v29 = vpop.f32.mrb[22].mxu0 }
 0x499   : > { %5016 = vst [vmem:[#allocation9_spill] sm:$0xff] %v4198_v29  ;;  %v4200_v18 = vpop.f32.mrb[23].mxu0 }
 0x49a   : > { %5017 = vst [vmem:[#allocation12_spill] sm:$0xff] %v4200_v18 }
 0x526   : > { %v1392_v9 = vpop.f32.mrb[24].mxu0 }
 0x527   : > { %v1394_v45 = vpop.f32.mrb[25].mxu0 }
 0x52a   : > { %v1398_v13 = vpop.f32.mrb[26].mxu0 }
 0x52b   : > { %v2839_v47 = vpack.c.bf16 %v1398_v13, %v1392_v9  ;;  %v1400_v12 = vpop.f32.mrb[27].mxu0 }
 0x52c   : > { %v2837_v39 = vpack.c.bf16 %v1400_v12, %v1394_v45 }
 0x52e   : > { %2838 = vmatprep.subr.bf16.mxu1 %v2837_v39 }
 0x52f   : > { %2840 = vmatpush1.bf16.msra.mxu1 %v2839_v47 }
 0x530   : > { %2842 = vmatprep.subr.bf16.mxu1 %v2841_v2  ;;  %v1530_v2 = vpop.trf.xlu1 }
 0x532   : > { %2728 = vmatmul.mubr.msk.f32.vlgmr.msra.gmra.mrb[64].mxu1 %vm428_vm2, %v182_v38 }
 0x533   : > { %2844 = vmatpush1.bf16.msra.mxu1 %v2843_v0  ;;  %1706 = vmatprep.mubr.f32.mxu1 %v4998_v41  ;;  %v1508_v0 = vpop.trf.xlu0 }
 0x534   : > { %v1531_v7 = vpop.trf.xlu1 }
 0x536   : > { %2729 = vmatmul.mubr.msk.f32.vlgmr.msra.gmra.mrb[66].mxu1 %vm428_vm2, %v1498_v57 }
 0x537   : > { %1712 = vmatprep.mubr.f32.mxu1 %v4998_v41  ;;  %v1509_v16 = vpop.trf.xlu0 }
 0x538   : > { %v1532_v1 = vpop.trf.xlu1 }
 0x53a   : > { %2730 = vmatmul.mubr.msk.f32.gmra.mrb[68].mxu1 %vm428_vm2, %v1499_v49 }
 0x53b   : > { %1718 = vmatprep.mubr.f32.mxu1 %v4998_v41  ;;  %v1510_v19 = vpop.trf.xlu0 }
 0x53c   : > { %v1533_v35 = vpop.trf.xlu1 }
 0x53e   : > { %2731 = vmatmul.mubr.msk.f32.gmra.mrb[70].mxu1 %vm428_vm2, %v1500_v30 }
 0x53f   : > { %1724 = vmatprep.mubr.f32.mxu1 %v4998_v41  ;;  %v1511_v24 = vpop.trf.xlu0 }
 0x540   : > { %v1534_v31 = vpop.trf.xlu1 }
 0x542   : > { %2732 = vmatmul.mubr.msk.f32.gmra.mrb[72].mxu1 %vm428_vm2, %v1501_v42 }
 0x543   : > { %1730 = vmatprep.mubr.f32.mxu1 %v4998_v41  ;;  %v1512_v37 = vpop.trf.xlu0 }
 0x544   : > { %v1535_v14 = vpop.trf.xlu1 }
 0x546   : > { %2733 = vmatmul.mubr.msk.f32.gmra.mrb[74].mxu1 %vm428_vm2, %v1502_v3 }
 0x547   : > { %1736 = vmatprep.mubr.f32.mxu1 %v4998_v41  ;;  %v1513_v15 = vpop.trf.xlu0 }
 0x548   : > { %v1536_v5 = vpop.trf.xlu1 }
 0x54a   : > { %2734 = vmatmul.mubr.msk.f32.gmra.mrb[76].mxu1 %vm428_vm2, %v1503_v25 }
 0x54b   : > { %1742 = vmatprep.mubr.f32.mxu1 %v4998_v41 }
 0x54c   : > { %v1537_v40 = vpop.trf.xlu1 }
 0x54e   : > { %2735 = vmatmul.mubr.msk.f32.gmra.mrb[78].mxu1 %vm428_vm2, %v1504_v26 }
 0x54f   : > { %1748 = vmatprep.mubr.f32.mxu1 %v4998_v41 }
 0x550   : > { %v1538_v60 = vpop.trf.xlu1 }
 0x552   : > { %2736 = vmatmul.mubr.msk.f32.gmra.mrb[80].mxu1 %vm428_vm2, %v1505_v21 }
 0x553   : > { %1754 = vmatprep.mubr.f32.mxu1 %v4998_v41 }
 0x554   : > { %v1539_v62 = vpop.trf.xlu1 }
 0x556   : > { %2737 = vmatmul.mubr.msk.f32.gmra.mrb[82].mxu1 %vm428_vm2, %v1506_v55 }
 0x557   : > { %1760 = vmatprep.mubr.f32.mxu1 %v4998_v41 }
 0x558   : > { %v1540_v36 = vpop.trf.xlu1 }
 0x55a   : > { %2738 = vmatmul.mubr.msk.f32.gmra.mrb[84].mxu1 %vm428_vm2, %v1507_v43 }
 0x55b   : > { %1766 = vmatprep.mubr.f32.mxu1 %v4998_v41 }
 0x55c   : > { %v1541_v28 = vpop.trf.xlu1 }
 0x55e   : > { %2739 = vmatmul.mubr.msk.f32.gmra.mrb[86].mxu1 %vm428_vm2, %v1508_v0 }
 0x55f   : > { %1772 = vmatprep.mubr.f32.mxu1 %v4998_v41 }
 0x560   : > { %v1542_v52 = vpop.trf.xlu1 }
 0x562   : > { %2740 = vmatmul.mubr.msk.f32.gmra.mrb[88].mxu1 %vm428_vm2, %v1509_v16 }
 0x563   : > { %1778 = vmatprep.mubr.f32.mxu1 %v4998_v41 }
 0x564   : > { %v1543_v20 = vpop.trf.xlu1 }
 0x566   : > { %2741 = vmatmul.mubr.msk.f32.gmra.mrb[90].mxu1 %vm428_vm2, %v1510_v19 }
 0x567   : > { %1784 = vmatprep.mubr.f32.mxu1 %v4998_v41 }
 0x568   : > { %v1544_v11 = vpop.trf.xlu1 }
 0x56a   : > { %2742 = vmatmul.mubr.msk.f32.gmra.mrb[92].mxu1 %vm428_vm2, %v1511_v24 }
 0x56b   : > { %1790 = vmatprep.mubr.f32.mxu1 %v4998_v41 }
 0x56c   : > { %v1545_v10 = vpop.trf.xlu1 }
 0x56e   : > { %2743 = vmatmul.mubr.msk.f32.gmra.mrb[94].mxu1 %vm428_vm2, %v1512_v37 }
 0x56f   : > { %1796 = vmatprep.mubr.f32.mxu1 %v4998_v41 }
 0x572   : > { %2744 = vmatmul.mubr.msk.f32.gmra.mrb[96].mxu1 %vm428_vm2, %v1513_v15 }
 0x573   : > { %1802 = vmatprep.mubr.f32.mxu1 %v4998_v41 }
 0x576   : > { %2745 = vmatmul.mubr.msk.f32.gmra.mrb[98].mxu1 %vm428_vm2, %v1530_v2 }
 0x577   : > { %1808 = vmatprep.mubr.f32.mxu1 %v4998_v41 }
 0x57a   : > { %2746 = vmatmul.mubr.msk.f32.gmra.mrb[100].mxu1 %vm428_vm2, %v1531_v7 }
 0x57b   : > { %1814 = vmatprep.mubr.f32.mxu1 %v4998_v41 }
 0x57e   : > { %2747 = vmatmul.mubr.msk.f32.gmra.mrb[102].mxu1 %vm428_vm2, %v1532_v1 }
 0x57f   : > { %1820 = vmatprep.mubr.f32.mxu1 %v4998_v41 }
 0x582   : > { %2748 = vmatmul.mubr.msk.f32.gmra.mrb[104].mxu1 %vm428_vm2, %v1533_v35 }
 0x583   : > { %1826 = vmatprep.mubr.f32.mxu1 %v4998_v41 }
 0x586   : > { %2749 = vmatmul.mubr.msk.f32.gmra.mrb[106].mxu1 %vm428_vm2, %v1534_v31 }
 0x587   : > { %1832 = vmatprep.mubr.f32.mxu1 %v4998_v41 }
 0x58a   : > { %2750 = vmatmul.mubr.msk.f32.gmra.mrb[108].mxu1 %vm428_vm2, %v1535_v14 }
 0x58b   : > { %1838 = vmatprep.mubr.f32.mxu1 %v4998_v41 }
 0x58e   : > { %2751 = vmatmul.mubr.msk.f32.gmra.mrb[110].mxu1 %vm428_vm2, %v1536_v5 }
 0x58f   : > { %1844 = vmatprep.mubr.f32.mxu1 %v4998_v41 }
 0x592   : > { %2752 = vmatmul.mubr.msk.f32.gmra.mrb[112].mxu1 %vm428_vm2, %v1537_v40 }
 0x593   : > { %1850 = vmatprep.mubr.f32.mxu1 %v4998_v41 }
 0x596   : > { %2753 = vmatmul.mubr.msk.f32.gmra.mrb[114].mxu1 %vm428_vm2, %v1538_v60 }
 0x597   : > { %1856 = vmatprep.mubr.f32.mxu1 %v4998_v41 }
 0x59a   : > { %2754 = vmatmul.mubr.msk.f32.gmra.mrb[116].mxu1 %vm428_vm2, %v1539_v62 }
 0x59b   : > { %1862 = vmatprep.mubr.f32.mxu1 %v4998_v41 }
 0x59e   : > { %2755 = vmatmul.mubr.msk.f32.gmra.mrb[118].mxu1 %vm428_vm2, %v1540_v36 }
 0x59f   : > { %1868 = vmatprep.mubr.f32.mxu1 %v4998_v41 }
 0x5a2   : > { %2756 = vmatmul.mubr.msk.f32.gmra.mrb[120].mxu1 %vm428_vm2, %v1541_v28 }
 0x5a3   : > { %1874 = vmatprep.mubr.f32.mxu1 %v4998_v41 }
 0x5a6   : > { %2757 = vmatmul.mubr.msk.f32.gmra.mrb[122].mxu1 %vm428_vm2, %v1542_v52 }
 0x5a7   : > { %1880 = vmatprep.mubr.f32.mxu1 %v4998_v41 }
 0x5aa   : > { %2758 = vmatmul.mubr.msk.f32.gmra.mrb[124].mxu1 %vm428_vm2, %v1543_v20 }
 0x5ab   : > { %1886 = vmatprep.mubr.f32.mxu1 %v4998_v41 }
 0x5ae   : > { %2759 = vmatmul.mubr.msk.f32.gmra.mrb[126].mxu1 %vm428_vm2, %v1544_v11 }
 0x5af   : > { %1892 = vmatprep.mubr.f32.mxu1 %v4998_v41 }
 0x5b2   : > { %2760 = vmatmul.mubr.msk.f32.gmra.mrb[128].mxu1 %vm428_vm2, %v1545_v10 }
 0x5b3   : > { %2588 = vmatprep.mubr.f32.mxu1 %v4998_v41 }
 0x605   : > { %v4277_v56 = vpop.f32.mrb[64].mxu1 }
 0x606   : > { %5018 = vst [vmem:[#allocation14_spill] sm:$0xff] %v4277_v56  ;;  %v4279_v44 = vpop.f32.mrb[65].mxu1 }
 0x607   : > { %5019 = vst [vmem:[#allocation13_spill] sm:$0xff] %v4279_v44 }
 0x609   : > { %v1708_v8 = vpop.f32.mrb[66].mxu1 }
 0x60a   : > { %v4283_v59 = vmul.f32 0.25, %v1708_v8  ;;  %v1710_v27 = vpop.f32.mrb[67].mxu1 }
 0x60b   : > { %v4285_v63 = vmul.f32 0.25, %v1710_v27 }
 0x60d   : > { %v1963_v33 = vmax.f32 %v4283_v59, %v4285_v63  ;;  %v1714_v4 = vpop.f32.mrb[68].mxu1 }
 0x60e   : > { %v4289_v50 = vmul.f32 0.25, %v1714_v4  ;;  %v1716_v41 = vpop.f32.mrb[69].mxu1 }
 0x60f   : > { %v4291_v58 = vmul.f32 0.25, %v1716_v41  ;;  %1964 = vmax.xlane.f32.xlu0 %v1963_v33 }
 0x611   : > { %v1966_v32 = vmax.f32 %v4289_v50, %v4291_v58  ;;  %v1720_v17 = vpop.f32.mrb[70].mxu1 }
 0x612   : > { %v4295_v23 = vmul.f32 0.25, %v1720_v17  ;;  %v1722_v48 = vpop.f32.mrb[71].mxu1 }
 0x613   : > { %v4297_v34 = vmul.f32 0.25, %v1722_v48  ;;  %1967 = vmax.xlane.f32.xlu1 %v1966_v32 }
 0x615   : > { %v1969_v54 = vmax.f32 %v4295_v23, %v4297_v34  ;;  %v1726_v6 = vpop.f32.mrb[72].mxu1 }
 0x616   : > { %v4301_v22 = vmul.f32 0.25, %v1726_v6  ;;  %v1728_v53 = vpop.f32.mrb[73].mxu1 }
 0x617   : > { %v4303_v51 = vmul.f32 0.25, %v1728_v53  ;;  %1970 = vmax.xlane.f32.xlu0 %v1969_v54 }
 0x619   : > { %v1972_v57 = vmax.f32 %v4301_v22, %v4303_v51  ;;  %v1732_v49 = vpop.f32.mrb[74].mxu1 }
 0x61a   : > { %v4307_v30 = vmul.f32 0.25, %v1732_v49  ;;  %v1734_v9 = vpop.f32.mrb[75].mxu1 }
 0x61b   : > { %v4309_v45 = vmul.f32 0.25, %v1734_v9  ;;  %1973 = vmax.xlane.f32.xlu1 %v1972_v57 }
 0x61d   : > { %v1975_v42 = vmax.f32 %v4307_v30, %v4309_v45  ;;  %v1738_v13 = vpop.f32.mrb[76].mxu1 }
 0x61e   : > { %v4313_v47 = vmul.f32 0.25, %v1738_v13  ;;  %v1740_v12 = vpop.f32.mrb[77].mxu1 }
 0x61f   : > { %v4315_v39 = vmul.f32 0.25, %v1740_v12  ;;  %1976 = vmax.xlane.f32.xlu0 %v1975_v42 }
 0x621   : > { %v1978_v3 = vmax.f32 %v4313_v47, %v4315_v39  ;;  %v1744_v38 = vpop.f32.mrb[78].mxu1 }
 0x622   : > { %v4319_v25 = vmul.f32 0.25, %v1744_v38  ;;  %v1746_v26 = vpop.f32.mrb[79].mxu1 }
 0x623   : > { %v4321_v21 = vmul.f32 0.25, %v1746_v26  ;;  %1979 = vmax.xlane.f32.xlu1 %v1978_v3 }
 0x625   : > { %v1981_v55 = vmax.f32 %v4319_v25, %v4321_v21  ;;  %v1750_v43 = vpop.f32.mrb[80].mxu1 }
 0x626   : > { %v4325_v0 = vmul.f32 0.25, %v1750_v43  ;;  %v1752_v16 = vpop.f32.mrb[81].mxu1 }
 0x627   : > { %v4327_v2 = vmul.f32 0.25, %v1752_v16  ;;  %1982 = vmax.xlane.f32.xlu0 %v1981_v55 }
 0x629   : > { %v1984_v19 = vmax.f32 %v4325_v0, %v4327_v2  ;;  %v1756_v7 = vpop.f32.mrb[82].mxu1 }
 0x62a   : > { %v4331_v24 = vmul.f32 0.25, %v1756_v7  ;;  %v1758_v1 = vpop.f32.mrb[83].mxu1 }
 0x62b   : > { %v4333_v37 = vmul.f32 0.25, %v1758_v1  ;;  %1985 = vmax.xlane.f32.xlu1 %v1984_v19 }
 0x62d   : > { %v1987_v35 = vmax.f32 %v4331_v24, %v4333_v37  ;;  %v1762_v15 = vpop.f32.mrb[84].mxu1 }
 0x62e   : > { %v4337_v31 = vmul.f32 0.25, %v1762_v15  ;;  %v1764_v14 = vpop.f32.mrb[85].mxu1 }
 0x62f   : > { %v4339_v5 = vmul.f32 0.25, %v1764_v14  ;;  %1988 = vmax.xlane.f32.xlu0 %v1987_v35 }
 0x631   : > { %v1990_v40 = vmax.f32 %v4337_v31, %v4339_v5  ;;  %v1768_v60 = vpop.f32.mrb[86].mxu1 }
 0x632   : > { %v4343_v62 = vmul.f32 0.25, %v1768_v60  ;;  %v1770_v36 = vpop.f32.mrb[87].mxu1 }
 0x633   : > { %v4345_v28 = vmul.f32 0.25, %v1770_v36  ;;  %1991 = vmax.xlane.f32.xlu1 %v1990_v40 }
 0x635   : > { %v1993_v52 = vmax.f32 %v4343_v62, %v4345_v28  ;;  %v1774_v20 = vpop.f32.mrb[88].mxu1 }
 0x636   : > { %v4349_v11 = vmul.f32 0.25, %v1774_v20  ;;  %v1776_v10 = vpop.f32.mrb[89].mxu1 }
 0x637   : > { %v4351_v8 = vmul.f32 0.25, %v1776_v10  ;;  %1994 = vmax.xlane.f32.xlu0 %v1993_v52 }
 0x639   : > { %v1996_v27 = vmax.f32 %v4349_v11, %v4351_v8  ;;  %v1780_v33 = vpop.f32.mrb[90].mxu1 }
 0x63a   : > { %v4355_v4 = vmul.f32 0.25, %v1780_v33  ;;  %v1782_v41 = vpop.f32.mrb[91].mxu1 }
 0x63b   : > { %v4357_v32 = vmul.f32 0.25, %v1782_v41  ;;  %1997 = vmax.xlane.f32.xlu1 %v1996_v27 }
 0x63d   : > { %v1999_v17 = vmax.f32 %v4355_v4, %v4357_v32  ;;  %v1786_v48 = vpop.f32.mrb[92].mxu1 }
 0x63e   : > { %v4361_v54 = vmul.f32 0.25, %v1786_v48  ;;  %v1788_v6 = vpop.f32.mrb[93].mxu1 }
 0x63f   : > { %v4363_v53 = vmul.f32 0.25, %v1788_v6  ;;  %2000 = vmax.xlane.f32.xlu0 %v1999_v17 }
 0x641   : > { %v2002_v57 = vmax.f32 %v4361_v54, %v4363_v53  ;;  %v1792_v49 = vpop.f32.mrb[94].mxu1 }
 0x642   : > { %v4367_v9 = vmul.f32 0.25, %v1792_v49  ;;  %v1794_v42 = vpop.f32.mrb[95].mxu1 }
 0x643   : > { %v4369_v13 = vmul.f32 0.25, %v1794_v42  ;;  %2003 = vmax.xlane.f32.xlu1 %v2002_v57 }
 0x645   : > { %v2005_v12 = vmax.f32 %v4367_v9, %v4369_v13  ;;  %v1798_v3 = vpop.f32.mrb[96].mxu1 }
 0x646   : > { %v4373_v38 = vmul.f32 0.25, %v1798_v3  ;;  %v1800_v26 = vpop.f32.mrb[97].mxu1 }
 0x647   : > { %v4375_v55 = vmul.f32 0.25, %v1800_v26  ;;  %2006 = vmax.xlane.f32.xlu0 %v2005_v12 }
 0x649   : > { %v2008_v43 = vmax.f32 %v4373_v38, %v4375_v55  ;;  %v1804_v16 = vpop.f32.mrb[98].mxu1 }
 0x64a   : > { %v4379_v19 = vmul.f32 0.25, %v1804_v16  ;;  %v1806_v7 = vpop.f32.mrb[99].mxu1 }
 0x64b   : > { %v4381_v1 = vmul.f32 0.25, %v1806_v7  ;;  %2009 = vmax.xlane.f32.xlu1 %v2008_v43 }
 0x64d   : > { %v2011_v35 = vmax.f32 %v4379_v19, %v4381_v1  ;;  %v1810_v15 = vpop.f32.mrb[100].mxu1 }
 0x64e   : > { %v4385_v14 = vmul.f32 0.25, %v1810_v15  ;;  %v1812_v40 = vpop.f32.mrb[101].mxu1 }
 0x64f   : > { %v4387_v60 = vmul.f32 0.25, %v1812_v40  ;;  %2012 = vmax.xlane.f32.xlu0 %v2011_v35 }
 0x651   : > { %5020 = vst [vmem:[#allocation11_spill] sm:$0xff] %v4387_v60  ;;  %v2014_v36 = vmax.f32 %v4385_v14, %v4387_v60  ;;  %v1816_v52 = vpop.f32.mrb[102].mxu1 }
 0x652   : > { %v4391_v20 = vmul.f32 0.25, %v1816_v52  ;;  %v1818_v10 = vpop.f32.mrb[103].mxu1 }
 0x653   : > { %v4393_v27 = vmul.f32 0.25, %v1818_v10  ;;  %2015 = vmax.xlane.f32.xlu1 %v2014_v36 }
 0x654   : > { %5021 = vst [vmem:[#allocation5_spill] sm:$0xff] %v4391_v20 }
 0x655   : > { %5022 = vst [vmem:[#allocation7_spill] sm:$0xff] %v4393_v27  ;;  %v2017_v33 = vmax.f32 %v4391_v20, %v4393_v27  ;;  %v1822_v41 = vpop.f32.mrb[104].mxu1 }
 0x656   : > { %v4397_v17 = vmul.f32 0.25, %v1822_v41  ;;  %v1824_v48 = vpop.f32.mrb[105].mxu1 }
 0x657   : > { %v4399_v6 = vmul.f32 0.25, %v1824_v48  ;;  %2018 = vmax.xlane.f32.xlu0 %v2017_v33 }
 0x658   : > { %5023 = vst [vmem:[#allocation16_spill] sm:$0xff] %v4397_v17 }
 0x659   : > { %5024 = vst [vmem:[#allocation18_spill] sm:$0xff] %v4399_v6  ;;  %v2020_v57 = vmax.f32 %v4397_v17, %v4399_v6  ;;  %v1828_v49 = vpop.f32.mrb[106].mxu1 }
 0x65a   : > { %v4403_v42 = vmul.f32 0.25, %v1828_v49  ;;  %v1830_v12 = vpop.f32.mrb[107].mxu1 }
 0x65b   : > { %v4405_v3 = vmul.f32 0.25, %v1830_v12  ;;  %2021 = vmax.xlane.f32.xlu1 %v2020_v57 }
 0x65c   : > { %5025 = vst [vmem:[#allocation17_spill] sm:$0xff] %v4403_v42 }
 0x65d   : > { %5026 = vst [vmem:[#allocation15_spill] sm:$0xff] %v4405_v3  ;;  %v2023_v26 = vmax.f32 %v4403_v42, %v4405_v3  ;;  %v1834_v43 = vpop.f32.mrb[108].mxu1 }
 0x65e   : > { %v4409_v16 = vmul.f32 0.25, %v1834_v43  ;;  %v1836_v7 = vpop.f32.mrb[109].mxu1 }
 0x65f   : > { %v4411_v35 = vmul.f32 0.25, %v1836_v7  ;;  %2024 = vmax.xlane.f32.xlu0 %v2023_v26 }
 0x660   : > { %5027 = vst [vmem:[#allocation6_spill] sm:$0xff] %v4409_v16 }
 0x661   : > { %5028 = vst [vmem:[#allocation20_spill] sm:$0xff] %v4411_v35  ;;  %v2026_v15 = vmax.f32 %v4409_v16, %v4411_v35  ;;  %v1840_v40 = vpop.f32.mrb[110].mxu1 }
 0x662   : > { %v4415_v36 = vmul.f32 0.25, %v1840_v40  ;;  %v1842_v52 = vpop.f32.mrb[111].mxu1 }
 0x663   : > { %v4417_v10 = vmul.f32 0.25, %v1842_v52  ;;  %2027 = vmax.xlane.f32.xlu1 %v2026_v15 }
 0x664   : > { %5029 = vst [vmem:[#allocation22_spill] sm:$0xff] %v4415_v36 }
 0x665   : > { %5030 = vst [vmem:[#allocation21_spill] sm:$0xff] %v4417_v10  ;;  %v2029_v33 = vmax.f32 %v4415_v36, %v4417_v10  ;;  %v1846_v41 = vpop.f32.mrb[112].mxu1 }
 0x666   : > { %v4421_v48 = vmul.f32 0.25, %v1846_v41  ;;  %v1848_v57 = vpop.f32.mrb[113].mxu1 }
 0x667   : > { %v4423_v49 = vmul.f32 0.25, %v1848_v57  ;;  %2030 = vmax.xlane.f32.xlu0 %v2029_v33 }
 0x668   : > { %5031 = vst [vmem:[#allocation19_spill] sm:$0xff] %v4421_v48 }
 0x669   : > { %5032 = vst [vmem:[#allocation8_spill] sm:$0xff] %v4423_v49  ;;  %v2032_v12 = vmax.f32 %v4421_v48, %v4423_v49  ;;  %v1852_v26 = vpop.f32.mrb[114].mxu1 }
 0x66a   : > { %v1854_v43 = vpop.f32.mrb[115].mxu1 }
 0x66b   : > { %2033 = vmax.xlane.f32.xlu1 %v2032_v12 }
 0x66d   : > { %v1858_v7 = vpop.f32.mrb[116].mxu1 }
 0x66e   : > { %v1860_v40 = vpop.f32.mrb[117].mxu1 }
 0x671   : > { %v1864_v52 = vpop.f32.mrb[118].mxu1 }
 0x672   : > { %v1866_v15 = vpop.f32.mrb[119].mxu1 }
 0x675   : > { %v4427_v61 = vpop.f32.mrb[120].mxu1 }
 0x676   : > { %v4429_v44 = vpop.f32.mrb[121].mxu1 }
 0x679   : > { %v4431_v41 = vpop.f32.mrb[122].mxu1 }
 0x67a   : > { %v4433_v56 = vpop.f32.mrb[123].mxu1 }
 0x67d   : > { %v4435_v57 = vpop.f32.mrb[124].mxu1 }
 0x67e   : > { %v4437_v33 = vpop.f32.mrb[125].mxu1 }
 0x681   : > { %v4439_v29 = vpop.f32.mrb[126].mxu1 }
 0x682   : > { %v4441_v18 = vpop.f32.mrb[127].mxu1 }
 0x685   : > { %v4443_v12 = vpop.f32.mrb[128].mxu1 }
 0x686   : > { %v4445_v46 = vpop.f32.mrb[129].mxu1 }
 0x69c   : > { %v1965_v49 = vpop.xlane.xlu0 %1964 }
 0x69d   : > { %v2059_v48 = vsub.f32 %v4283_v59, %v1965_v49  ;;  %v2060_v10 = vsub.f32 %v4285_v63, %v1965_v49  ;;  %v4473_v49 = vmul.f32 0.25, %v1860_v40 }
 0x69f   : > { %v2123_v36 = vmul.f32 1.442695, %v2059_v48  ;;  %v2125_v35 = vmul.f32 1.442695, %v2060_v10  ;;  %v4471_v10 = vmul.f32 0.25, %v1858_v7 }
 0x6a0   : > { %v1968_v16 = vpop.xlane.xlu1 %1967 }
 0x6a1   : > { %3147 = vpow2.f32 %v2123_v36  ;;  %v2061_v3 = vsub.f32 %v4289_v50, %v1968_v16  ;;  %v2062_v42 = vsub.f32 %v4291_v58, %v1968_v16  ;;  %v4455_v58 = vmul.f32 0.25, %v1852_v26 }
 0x6a2   : > { %3149 = vpow2.f32 %v2125_v35 }
 0x6a3   : > { %v2127_v6 = vmul.f32 1.442695, %v2061_v3  ;;  %v2129_v17 = vmul.f32 1.442695, %v2062_v42  ;;  %v4457_v3 = vmul.f32 0.25, %v1854_v43 }
 0x6a4   : > { %v1971_v27 = vpop.xlane.xlu0 %1970 }
 0x6a5   : > { %3151 = vpow2.f32 %v2127_v6  ;;  %v2063_v20 = vsub.f32 %v4295_v23, %v1971_v27  ;;  %v2064_v60 = vsub.f32 %v4297_v34, %v1971_v27 }
 0x6a6   : > { %3153 = vpow2.f32 %v2129_v17 }
 0x6a7   : > { %v2131_v59 = vmul.f32 1.442695, %v2063_v20  ;;  %v2133_v63 = vmul.f32 1.442695, %v2064_v60 }
 0x6a8   : > { %v1974_v48 = vpop.xlane.xlu1 %1973 }
 0x6a9   : > { %3155 = vpow2.f32 %v2131_v59  ;;  %v2065_v36 = vsub.f32 %v4301_v22, %v1974_v48  ;;  %v2066_v50 = vsub.f32 %v4303_v51, %v1974_v48  ;;  %v2035_v51 = vmax.f32 %v4455_v58, %v4457_v3 }
 0x6aa   : > { %3157 = vpow2.f32 %v2133_v63  ;;  %v4481_v63 = vmul.f32 0.25, %v1864_v52  ;;  %v4483_v48 = vmul.f32 0.25, %v1866_v15 }
 0x6ab   : > { %v4459_v42 = vpop.eup %3147  ;;  %v2135_v6 = vmul.f32 1.442695, %v2065_v36  ;;  %v2137_v23 = vmul.f32 1.442695, %v2066_v50  ;;  %v2038_v50 = vmax.f32 %v4471_v10, %v4473_v49 }
 0x6ac   : > { %v4461_v16 = vpop.eup %3149  ;;  %v1977_v34 = vpop.xlane.xlu0 %1976 }
 0x6ad   : > { %3159 = vpow2.f32 %v2135_v6  ;;  %v2067_v60 = vsub.f32 %v4307_v30, %v1977_v34  ;;  %v2068_v20 = vsub.f32 %v4309_v45, %v1977_v34  ;;  %v2251_v22 = vadd.f32 %v4461_v16, %v4459_v42 }
 0x6ae   : > { %3161 = vpow2.f32 %v2137_v23  ;;  %v2041_v23 = vmax.f32 %v4481_v63, %v4483_v48 }
 0x6af   : > { %v4469_v27 = vpop.eup %3151  ;;  %v2139_v17 = vmul.f32 1.442695, %v2067_v60  ;;  %v2141_v35 = vmul.f32 1.442695, %v2068_v20  ;;  %2252 = vadd.xlane.f32.xlu0 %v2251_v22  ;;  %v4500_v22 = vmul.f32 0.25, %v4427_v61  ;;  %v4515_v61 = vmul.f32 0.25, %v4433_v56 }
 0x6b0   : > { %v4475_v26 = vpop.eup %3153  ;;  %v1980_v30 = vpop.xlane.xlu1 %1979 }
 0x6b1   : > { %3163 = vpow2.f32 %v2139_v17  ;;  %v2069_v45 = vsub.f32 %v4313_v47, %v1980_v30  ;;  %v2070_v43 = vsub.f32 %v4315_v39, %v1980_v30  ;;  %v2254_v59 = vadd.f32 %v4475_v26, %v4469_v27 }
 0x6b2   : > { %3165 = vpow2.f32 %v2141_v35 }
 0x6b3   : > { %v4485_v7 = vpop.eup %3155  ;;  %v2143_v40 = vmul.f32 1.442695, %v2069_v45  ;;  %v2145_v36 = vmul.f32 1.442695, %v2070_v43  ;;  %2255 = vadd.xlane.f32.xlu1 %v2254_v59  ;;  %2036 = vmax.xlane.f32.xlu0 %v2035_v51  ;;  %v4512_v45 = vmul.f32 0.25, %v4431_v41 }
 0x6b4   : > { %v4489_v47 = vpop.eup %3157  ;;  %v1983_v39 = vpop.xlane.xlu0 %1982 }
 0x6b5   : > { %3167 = vpow2.f32 %v2143_v40  ;;  %v2071_v6 = vsub.f32 %v4319_v25, %v1983_v39  ;;  %v2072_v52 = vsub.f32 %v4321_v21, %v1983_v39  ;;  %v2257_v15 = vadd.f32 %v4489_v47, %v4485_v7 }
 0x6b6   : > { %3169 = vpow2.f32 %v2145_v36  ;;  %v4503_v25 = vmul.f32 0.25, %v4429_v44 }
 0x6b7   : > { %v4497_v34 = vpop.eup %3159  ;;  %v2147_v60 = vmul.f32 1.442695, %v2071_v6  ;;  %v2149_v20 = vmul.f32 1.442695, %v2072_v52  ;;  %2258 = vadd.xlane.f32.xlu0 %v2257_v15  ;;  %2039 = vmax.xlane.f32.xlu1 %v2038_v50  ;;  %v2047_v50 = vmax.f32 %v4512_v45, %v4515_v61  ;;  %v4532_v15 = vmul.f32 0.25, %v4435_v57 }
 0x6b8   : > { %v4505_v21 = vpop.eup %3161  ;;  %v1986_v51 = vpop.xlane.xlu1 %1985  ;;  %v2044_v40 = vmax.f32 %v4500_v22, %v4503_v25  ;;  %v4547_v57 = vmul.f32 0.25, %v4441_v18 }
 0x6b9   : > { %3171 = vpow2.f32 %v2147_v60  ;;  %v2073_v17 = vsub.f32 %v4325_v0, %v1986_v51  ;;  %v2074_v35 = vsub.f32 %v4327_v2, %v1986_v51  ;;  %v2260_v30 = vadd.f32 %v4505_v21, %v4497_v34 }
 0x6ba   : > { %3173 = vpow2.f32 %v2149_v20 }
 0x6bb   : > { %v4517_v44 = vpop.eup %3163  ;;  %v2151_v43 = vmul.f32 1.442695, %v2073_v17  ;;  %v2153_v59 = vmul.f32 1.442695, %v2074_v35  ;;  %2261 = vadd.xlane.f32.xlu1 %v2260_v30  ;;  %2042 = vmax.xlane.f32.xlu0 %v2041_v23  ;;  %v4544_v17 = vmul.f32 0.25, %v4439_v29 }
 0x6bc   : > { %v4521_v0 = vpop.eup %3165  ;;  %v1989_v2 = vpop.xlane.xlu0 %1988 }
 0x6bd   : > { %3175 = vpow2.f32 %v2151_v43  ;;  %v2075_v36 = vsub.f32 %v4331_v24, %v1989_v2  ;;  %v2076_v41 = vsub.f32 %v4333_v37, %v1989_v2  ;;  %v2263_v56 = vadd.f32 %v4521_v0, %v4517_v44 }
 0x6be   : > { %3177 = vpow2.f32 %v2153_v59  ;;  %v4535_v24 = vmul.f32 0.25, %v4437_v33 }
 0x6bf   : > { %v4529_v39 = vpop.eup %3167  ;;  %v2155_v6 = vmul.f32 1.442695, %v2075_v36  ;;  %v2157_v52 = vmul.f32 1.442695, %v2076_v41  ;;  %2264 = vadd.xlane.f32.xlu0 %v2263_v56  ;;  %2045 = vmax.xlane.f32.xlu1 %v2044_v40  ;;  %v2053_v40 = vmax.f32 %v4544_v17, %v4547_v57  ;;  %v4564_v56 = vmul.f32 0.25, %v4443_v12 }
 0x6c0   : > { %v4537_v37 = vpop.eup %3169  ;;  %v1992_v23 = vpop.xlane.xlu1 %1991  ;;  %v2050_v43 = vmax.f32 %v4532_v15, %v4535_v24 }
 0x6c1   : > { %3179 = vpow2.f32 %v2155_v6  ;;  %v2077_v60 = vsub.f32 %v4337_v31, %v1992_v23  ;;  %v2078_v20 = vsub.f32 %v4339_v5, %v1992_v23  ;;  %v2266_v51 = vadd.f32 %v4537_v37, %v4529_v39 }
 0x6c2   : > { %3181 = vpow2.f32 %v2157_v52 }
 0x6c3   : > { %v4549_v33 = vpop.eup %3171  ;;  %v2159_v35 = vmul.f32 1.442695, %v2077_v60  ;;  %v2161_v30 = vmul.f32 1.442695, %v2078_v20  ;;  %2267 = vadd.xlane.f32.xlu1 %v2266_v51  ;;  %2048 = vmax.xlane.f32.xlu0 %v2047_v50 }
 0x6c4   : > { %v4553_v31 = vpop.eup %3173  ;;  %v1995_v5 = vpop.xlane.xlu0 %1994 }
 0x6c5   : > { %3183 = vpow2.f32 %v2159_v35  ;;  %v2079_v59 = vsub.f32 %v4343_v62, %v1995_v5  ;;  %v2080_v29 = vsub.f32 %v4345_v28, %v1995_v5  ;;  %v2269_v18 = vadd.f32 %v4553_v31, %v4549_v33 }
 0x6c6   : > { %3185 = vpow2.f32 %v2161_v30  ;;  %v4567_v62 = vmul.f32 0.25, %v4445_v46 }
 0x6c7   : > { %v4561_v2 = vpop.eup %3175  ;;  %v2163_v36 = vmul.f32 1.442695, %v2079_v59  ;;  %v2165_v41 = vmul.f32 1.442695, %v2080_v29  ;;  %2270 = vadd.xlane.f32.xlu0 %v2269_v18  ;;  %2051 = vmax.xlane.f32.xlu1 %v2050_v43 }
 0x6c8   : > { %v4569_v28 = vpop.eup %3177  ;;  %v1998_v50 = vpop.xlane.xlu1 %1997  ;;  %v2056_v46 = vmax.f32 %v4564_v56, %v4567_v62 }
 0x6c9   : > { %3187 = vpow2.f32 %v2163_v36  ;;  %v2081_v6 = vsub.f32 %v4349_v11, %v1998_v50  ;;  %v2082_v52 = vsub.f32 %v4351_v8, %v1998_v50  ;;  %v2272_v23 = vadd.f32 %v4569_v28, %v4561_v2 }
 0x6ca   : > { %3189 = vpow2.f32 %v2165_v41 }
 0x6cb   : > { %v4575_v60 = vpop.eup %3179  ;;  %v2167_v20 = vmul.f32 1.442695, %v2081_v6  ;;  %v2169_v12 = vmul.f32 1.442695, %v2082_v52  ;;  %2273 = vadd.xlane.f32.xlu1 %v2272_v23  ;;  %2054 = vmax.xlane.f32.xlu0 %v2053_v40 }
 0x6cc   : > { %v4579_v51 = vpop.eup %3181  ;;  %v2001_v35 = vpop.xlane.xlu0 %2000 }
 0x6cd   : > { %3191 = vpow2.f32 %v2167_v20  ;;  %v2083_v11 = vsub.f32 %v4355_v4, %v2001_v35  ;;  %v2084_v8 = vsub.f32 %v4357_v32, %v2001_v35  ;;  %v2275_v30 = vadd.f32 %v4579_v51, %v4575_v60 }
 0x6ce   : > { %3193 = vpow2.f32 %v2169_v12 }
 0x6cf   : > { %v4585_v43 = vpop.eup %3183  ;;  %v2171_v5 = vmul.f32 1.442695, %v2083_v11  ;;  %v2173_v59 = vmul.f32 1.442695, %v2084_v8  ;;  %2276 = vadd.xlane.f32.xlu0 %v2275_v30  ;;  %2057 = vmax.xlane.f32.xlu1 %v2056_v46 }
 0x6d0   : > { %v4587_v29 = vpop.eup %3185  ;;  %v2004_v18 = vpop.xlane.xlu1 %2003 }
 0x6d1   : > { %3195 = vpow2.f32 %v2171_v5  ;;  %v2085_v40 = vsub.f32 %v4361_v54, %v2004_v18  ;;  %v2086_v4 = vsub.f32 %v4363_v53, %v2004_v18  ;;  %v2278_v32 = vadd.f32 %v4587_v29, %v4585_v43 }
 0x6d2   : > { %3197 = vpow2.f32 %v2173_v59 }
 0x6d3   : > { %v4593_v36 = vpop.eup %3187  ;;  %v2175_v41 = vmul.f32 1.442695, %v2085_v40  ;;  %v2177_v50 = vmul.f32 1.442695, %v2086_v4  ;;  %2279 = vadd.xlane.f32.xlu1 %v2278_v32 }
 0x6d4   : > { %v4595_v6 = vpop.eup %3189  ;;  %v2007_v52 = vpop.xlane.xlu0 %2006 }
 0x6d5   : > { %3199 = vpow2.f32 %v2175_v41  ;;  %v2087_v23 = vsub.f32 %v4367_v9, %v2007_v52  ;;  %v2088_v20 = vsub.f32 %v4369_v13, %v2007_v52  ;;  %v2281_v54 = vadd.f32 %v4595_v6, %v4593_v36 }
 0x6d6   : > { %3201 = vpow2.f32 %v2177_v50 }
 0x6d7   : > { %v4601_v53 = vpop.eup %3191  ;;  %v2179_v12 = vmul.f32 1.442695, %v2087_v23  ;;  %v2181_v46 = vmul.f32 1.442695, %v2088_v20  ;;  %2282 = vadd.xlane.f32.xlu0 %v2281_v54  ;;  %v5033_v54 = vld [vmem:[#allocation11_spill] sm:$0xff] }
 0x6d8   : > { %v4603_v35 = vpop.eup %3193  ;;  %v2010_v11 = vpop.xlane.xlu1 %2009 }
 0x6d9   : > { %3203 = vpow2.f32 %v2179_v12  ;;  %v2089_v8 = vsub.f32 %v4373_v38, %v2010_v11  ;;  %v2090_v30 = vsub.f32 %v4375_v55, %v2010_v11  ;;  %v2284_v9 = vadd.f32 %v4603_v35, %v4601_v53 }
 0x6da   : > { %3205 = vpow2.f32 %v2181_v46 }
 0x6db   : > { %v4609_v13 = vpop.eup %3195  ;;  %v2183_v5 = vmul.f32 1.442695, %v2089_v8  ;;  %v2185_v59 = vmul.f32 1.442695, %v2090_v30  ;;  %2285 = vadd.xlane.f32.xlu1 %v2284_v9  ;;  %v5035_v9 = vld [vmem:[#allocation5_spill] sm:$0xff] }
 0x6dc   : > { %v4611_v18 = vpop.eup %3197  ;;  %v2013_v40 = vpop.xlane.xlu0 %2012 }
 0x6dd   : > { %3207 = vpow2.f32 %v2183_v5  ;;  %v2091_v4 = vsub.f32 %v4379_v19, %v2013_v40  ;;  %v2092_v32 = vsub.f32 %v4381_v1, %v2013_v40  ;;  %v2287_v38 = vadd.f32 %v4611_v18, %v4609_v13 }
 0x6de   : > { %3209 = vpow2.f32 %v2185_v59  ;;  %v5036_v59 = vld [vmem:[#allocation7_spill] sm:$0xff] }
 0x6df   : > { %v4617_v55 = vpop.eup %3199  ;;  %v2187_v41 = vmul.f32 1.442695, %v2091_v4  ;;  %v2189_v50 = vmul.f32 1.442695, %v2092_v32  ;;  %2288 = vadd.xlane.f32.xlu0 %v2287_v38 }
 0x6e0   : > { %v4619_v52 = vpop.eup %3201  ;;  %v2016_v23 = vpop.xlane.xlu1 %2015 }
 0x6e1   : > { %3211 = vpow2.f32 %v2187_v41  ;;  %v2093_v20 = vsub.f32 %v4385_v14, %v2016_v23  ;;  %v2094_v12 = vsub.f32 %v5033_v54, %v2016_v23  ;;  %v2290_v19 = vadd.f32 %v4619_v52, %v4617_v55  ;;  %v5038_v23 = vld [vmem:[#allocation16_spill] sm:$0xff]  ;;  %v5039_v54 = vld [vmem:[#allocation18_spill] sm:$0xff] }
 0x6e2   : > { %3213 = vpow2.f32 %v2189_v50 }
 0x6e3   : > { %v4625_v1 = vpop.eup %3203  ;;  %v2191_v46 = vmul.f32 1.442695, %v2093_v20  ;;  %v2193_v11 = vmul.f32 1.442695, %v2094_v12  ;;  %2291 = vadd.xlane.f32.xlu1 %v2290_v19 }
 0x6e4   : > { %5034 = vst [vmem:[#allocation11_spill] sm:$0xff] %v4625_v1  ;;  %v4627_v8 = vpop.eup %3205  ;;  %v2019_v30 = vpop.xlane.xlu0 %2018 }
 0x6e5   : > { %3215 = vpow2.f32 %v2191_v46  ;;  %v2095_v5 = vsub.f32 %v5035_v9, %v2019_v30  ;;  %v2096_v40 = vsub.f32 %v5036_v59, %v2019_v30  ;;  %v2293_v14 = vadd.f32 %v4627_v8, %v4625_v1  ;;  %v5042_v59 = vld [vmem:[#allocation17_spill] sm:$0xff] }
 0x6e6   : > { %3217 = vpow2.f32 %v2193_v11 }
 0x6e7   : > { %v4633_v4 = vpop.eup %3207  ;;  %v2195_v32 = vmul.f32 1.442695, %v2095_v5  ;;  %v2197_v38 = vmul.f32 1.442695, %v2096_v40  ;;  %2294 = vadd.xlane.f32.xlu0 %v2293_v14  ;;  %v5043_v14 = vld [vmem:[#allocation15_spill] sm:$0xff] }
 0x6e8   : > { %5037 = vst [vmem:[#allocation5_spill] sm:$0xff] %v4633_v4  ;;  %v4635_v41 = vpop.eup %3209  ;;  %v2022_v50 = vpop.xlane.xlu1 %2021 }
 0x6e9   : > { %3219 = vpow2.f32 %v2195_v32  ;;  %v2097_v20 = vsub.f32 %v5038_v23, %v2022_v50  ;;  %v2098_v12 = vsub.f32 %v5039_v54, %v2022_v50  ;;  %v2296_v19 = vadd.f32 %v4635_v41, %v4633_v4 }
 0x6ea   : > { %3221 = vpow2.f32 %v2197_v38 }
 0x6eb   : > { %v4641_v46 = vpop.eup %3211  ;;  %v2199_v11 = vmul.f32 1.442695, %v2097_v20  ;;  %v2201_v30 = vmul.f32 1.442695, %v2098_v12  ;;  %2297 = vadd.xlane.f32.xlu1 %v2296_v19  ;;  %v5046_v19 = vld [vmem:[#allocation6_spill] sm:$0xff] }
 0x6ec   : > { %5040 = vst [vmem:[#allocation7_spill] sm:$0xff] %v4641_v46  ;;  %v4643_v9 = vpop.eup %3213  ;;  %v2025_v5 = vpop.xlane.xlu0 %2024 }
 0x6ed   : > { %5041 = vst [vmem:[#allocation16_spill] sm:$0xff] %v4643_v9  ;;  %3223 = vpow2.f32 %v2199_v11  ;;  %v2099_v40 = vsub.f32 %v5042_v59, %v2025_v5  ;;  %v2100_v32 = vsub.f32 %v5043_v14, %v2025_v5  ;;  %v2299_v50 = vadd.f32 %v4643_v9, %v4641_v46  ;;  %v5047_v11 = vld [vmem:[#allocation20_spill] sm:$0xff] }
 0x6ee   : > { %3225 = vpow2.f32 %v2201_v30 }
 0x6ef   : > { %v4649_v23 = vpop.eup %3215  ;;  %v2203_v38 = vmul.f32 1.442695, %v2099_v40  ;;  %v2205_v54 = vmul.f32 1.442695, %v2100_v32  ;;  %2300 = vadd.xlane.f32.xlu0 %v2299_v50  ;;  %v5048_v50 = vld [vmem:[#allocation22_spill] sm:$0xff] }
 0x6f0   : > { %5044 = vst [vmem:[#allocation18_spill] sm:$0xff] %v4649_v23  ;;  %v4651_v20 = vpop.eup %3217  ;;  %v2028_v12 = vpop.xlane.xlu1 %2027 }
 0x6f1   : > { %5045 = vst [vmem:[#allocation17_spill] sm:$0xff] %v4651_v20  ;;  %3227 = vpow2.f32 %v2203_v38  ;;  %v2101_v1 = vsub.f32 %v5046_v19, %v2028_v12  ;;  %v2102_v4 = vsub.f32 %v5047_v11, %v2028_v12  ;;  %v2302_v5 = vadd.f32 %v4651_v20, %v4649_v23  ;;  %v5049_v38 = vld [vmem:[#allocation21_spill] sm:$0xff] }
 0x6f2   : > { %3229 = vpow2.f32 %v2205_v54 }
 0x6f3   : > { %v4657_v59 = vpop.eup %3219  ;;  %v2207_v30 = vmul.f32 1.442695, %v2101_v1  ;;  %v2209_v14 = vmul.f32 1.442695, %v2102_v4  ;;  %2303 = vadd.xlane.f32.xlu1 %v2302_v5  ;;  %v5050_v5 = vld [vmem:[#allocation19_spill] sm:$0xff] }
 0x6f4   : > { %v4659_v40 = vpop.eup %3221  ;;  %v2031_v32 = vpop.xlane.xlu0 %2030 }
 0x6f5   : > { %3231 = vpow2.f32 %v2207_v30  ;;  %v2103_v46 = vsub.f32 %v5048_v50, %v2031_v32  ;;  %v2104_v9 = vsub.f32 %v5049_v38, %v2031_v32  ;;  %v2305_v12 = vadd.f32 %v4659_v40, %v4657_v59  ;;  %v5051_v30 = vld [vmem:[#allocation8_spill] sm:$0xff] }
 0x6f6   : > { %3233 = vpow2.f32 %v2209_v14 }
 0x6f7   : > { %v4665_v19 = vpop.eup %3223  ;;  %v2211_v54 = vmul.f32 1.442695, %v2103_v46  ;;  %v2213_v11 = vmul.f32 1.442695, %v2104_v9  ;;  %2306 = vadd.xlane.f32.xlu0 %v2305_v12 }
 0x6f8   : > { %v4667_v1 = vpop.eup %3225  ;;  %v2034_v4 = vpop.xlane.xlu1 %2033 }
 0x6f9   : > { %3235 = vpow2.f32 %v2211_v54  ;;  %v2105_v23 = vsub.f32 %v5050_v5, %v2034_v4  ;;  %v2106_v20 = vsub.f32 %v5051_v30, %v2034_v4  ;;  %v2308_v32 = vadd.f32 %v4667_v1, %v4665_v19 }
 0x6fa   : > { %3237 = vpow2.f32 %v2213_v11 }
 0x6fb   : > { %v4673_v50 = vpop.eup %3227  ;;  %v2215_v14 = vmul.f32 1.442695, %v2105_v23  ;;  %v2217_v38 = vmul.f32 1.442695, %v2106_v20  ;;  %2309 = vadd.xlane.f32.xlu1 %v2308_v32 }
 0x6fc   : > { %5052 = vst [vmem:[#allocation15_spill] sm:$0xff] %v4673_v50  ;;  %v4675_v46 = vpop.eup %3229 }
 0x6fd   : > { %5053 = vst [vmem:[#allocation6_spill] sm:$0xff] %v4675_v46  ;;  %3239 = vpow2.f32 %v2215_v14  ;;  %v2311_v9 = vadd.f32 %v4675_v46, %v4673_v50 }
 0x6fe   : > { %3241 = vpow2.f32 %v2217_v38 }
 0x6ff   : > { %v4679_v12 = vpop.eup %3231  ;;  %2312 = vadd.xlane.f32.xlu0 %v2311_v9 }
 0x700   : > { %5054 = vst [vmem:[#allocation20_spill] sm:$0xff] %v4679_v12  ;;  %v4681_v54 = vpop.eup %3233 }
 0x701   : > { %5055 = vst [vmem:[#allocation22_spill] sm:$0xff] %v4681_v54  ;;  %v2314_v11 = vadd.f32 %v4681_v54, %v4679_v12 }
 0x703   : > { %v4685_v4 = vpop.eup %3235  ;;  %2315 = vadd.xlane.f32.xlu1 %v2314_v11 }
 0x704   : > { %5056 = vst [vmem:[#allocation21_spill] sm:$0xff] %v4685_v4  ;;  %v4687_v23 = vpop.eup %3237 }
 0x705   : > { %5057 = vst [vmem:[#allocation19_spill] sm:$0xff] %v4687_v23  ;;  %v2317_v20 = vadd.f32 %v4687_v23, %v4685_v4 }
 0x707   : > { %v4691_v5 = vpop.eup %3239  ;;  %2318 = vadd.xlane.f32.xlu0 %v2317_v20 }
 0x708   : > { %5058 = vst [vmem:[#allocation8_spill] sm:$0xff] %v4691_v5  ;;  %v4693_v30 = vpop.eup %3241 }
 0x709   : > { %5059 = vst [vmem:[#allocation23_spill] sm:$0xff] %v4693_v30  ;;  %v2320_v32 = vadd.f32 %v4693_v30, %v4691_v5 }
 0x70b   : > { %2321 = vadd.xlane.f32.xlu1 %v2320_v32 }
 0x73c   : > { %v2253_v14 = vpop.xlane.xlu0 %2252 }
 0x73d   : > { %3243 = vrcp.f32 %v2253_v14 }
 0x740   : > { %v2256_v38 = vpop.xlane.xlu1 %2255  ;;  %v2037_v9 = vpop.xlane.xlu0 %2036 }
 0x741   : > { %3245 = vrcp.f32 %v2256_v38  ;;  %v2107_v11 = vsub.f32 %v4455_v58, %v2037_v9  ;;  %v2108_v50 = vsub.f32 %v4457_v3, %v2037_v9 }
 0x743   : > { %v2219_v12 = vmul.f32 1.442695, %v2107_v11  ;;  %v2221_v4 = vmul.f32 1.442695, %v2108_v50 }
 0x744   : > { %v2259_v23 = vpop.xlane.xlu0 %2258  ;;  %v2040_v54 = vpop.xlane.xlu1 %2039 }
 0x745   : > { %3247 = vpow2.f32 %v2219_v12  ;;  %v2109_v20 = vsub.f32 %v4471_v10, %v2040_v54  ;;  %v2110_v46 = vsub.f32 %v4473_v49, %v2040_v54 }
 0x746   : > { %3249 = vpow2.f32 %v2221_v4 }
 0x747   : > { %3251 = vrcp.f32 %v2259_v23  ;;  %v2223_v32 = vmul.f32 1.442695, %v2109_v20  ;;  %v2225_v14 = vmul.f32 1.442695, %v2110_v46  ;;  %v3244_v38 = vpop.eup %3243 }
 0x748   : > { %v2262_v5 = vpop.xlane.xlu1 %2261  ;;  %v2043_v30 = vpop.xlane.xlu0 %2042  ;;  %v2349_v49 = vmul.f32 %v3244_v38, %v4461_v16  ;;  %v2348_v46 = vmul.f32 %v3244_v38, %v4459_v42 }
 0x749   : > { %3253 = vpow2.f32 %v2223_v32  ;;  %v2111_v58 = vsub.f32 %v4481_v63, %v2043_v30  ;;  %v2112_v3 = vsub.f32 %v4483_v48, %v2043_v30 }
 0x74a   : > { %3255 = vpow2.f32 %v2225_v14 }
 0x74b   : > { %v3246_v50 = vpop.eup %3245  ;;  %3257 = vrcp.f32 %v2262_v5  ;;  %v2227_v12 = vmul.f32 1.442695, %v2111_v58  ;;  %v2229_v9 = vmul.f32 1.442695, %v2112_v3 }
 0x74c   : > { %v2265_v10 = vpop.xlane.xlu0 %2264  ;;  %v2046_v11 = vpop.xlane.xlu1 %2045  ;;  %v2352_v54 = vmul.f32 %v3246_v50, %v4475_v26  ;;  %v2351_v4 = vmul.f32 %v3246_v50, %v4469_v27 }
 0x74d   : > { %3259 = vpow2.f32 %v2227_v12  ;;  %v2113_v63 = vsub.f32 %v4500_v22, %v2046_v11  ;;  %v2114_v48 = vsub.f32 %v4503_v25, %v2046_v11 }
 0x74e   : > { %3261 = vpow2.f32 %v2229_v9  ;;  %v2845_v23 = vpack.c.bf16 %v2352_v54, %v2349_v49  ;;  %v2847_v5 = vpack.c.bf16 %v2351_v4, %v2348_v46 }
 0x74f   : > { %v4709_v30 = vpop.eup %3247  ;;  %3263 = vrcp.f32 %v2265_v10  ;;  %v2231_v20 = vmul.f32 1.442695, %v2113_v63  ;;  %v2233_v32 = vmul.f32 1.442695, %v2114_v48 }
 0x750   : > { %v4711_v16 = vpop.eup %3249  ;;  %2846 = vmatprep.subr.bf16.mxu0 %v2845_v23  ;;  %v2268_v26 = vpop.xlane.xlu1 %2267 }
 0x751   : > { %v2049_v42 = vpop.xlane.xlu0 %2048  ;;  %v3252_v14 = vpop.eup %3251  ;;  %3265 = vpow2.f32 %v2231_v20  ;;  %2848 = vmatpush1.bf16.xpose.msra.mxu0 %v2847_v5  ;;  %v2323_v25 = vadd.f32 %v4711_v16, %v4709_v30 }
 0x752   : > { %v2115_v27 = vsub.f32 %v4512_v45, %v2049_v42  ;;  %v2116_v22 = vsub.f32 %v4515_v61, %v2049_v42  ;;  %3267 = vpow2.f32 %v2233_v32  ;;  %v2355_v10 = vmul.f32 %v3252_v14, %v4489_v47 }
 0x753   : > { %v4717_v38 = vpop.eup %3253  ;;  %3269 = vrcp.f32 %v2268_v26  ;;  %2324 = vadd.xlane.f32.xlu0 %v2323_v25  ;;  %v2354_v46 = vmul.f32 %v3252_v14, %v4485_v7 }
 0x754   : > { %v2235_v58 = vmul.f32 1.442695, %v2115_v27  ;;  %v2237_v3 = vmul.f32 1.442695, %v2116_v22  ;;  %v4719_v50 = vpop.eup %3255  ;;  %v2052_v9 = vpop.xlane.xlu1 %2051 }
 0x755   : > { %v2271_v12 = vpop.xlane.xlu0 %2270  ;;  %v3258_v45 = vpop.eup %3257  ;;  %v2117_v61 = vsub.f32 %v4532_v15, %v2052_v9  ;;  %v2118_v11 = vsub.f32 %v4535_v24, %v2052_v9  ;;  %v2326_v49 = vadd.f32 %v4719_v50, %v4717_v38 }
 0x756   : > { %3271 = vpow2.f32 %v2235_v58  ;;  %v2358_v54 = vmul.f32 %v3258_v45, %v4505_v21  ;;  %v2357_v4 = vmul.f32 %v3258_v45, %v4497_v34 }
 0x757   : > { %3273 = vpow2.f32 %v2237_v3  ;;  %v4729_v63 = vpop.eup %3259  ;;  %v2239_v48 = vmul.f32 1.442695, %v2117_v61  ;;  %v2241_v47 = vmul.f32 1.442695, %v2118_v11  ;;  %2327 = vadd.xlane.f32.xlu1 %v2326_v49 }
 0x758   : > { %v4731_v23 = vpop.eup %3261  ;;  %3275 = vrcp.f32 %v2271_v12  ;;  %v2849_v15 = vpack.c.bf16 %v2358_v54, %v2355_v10  ;;  %v2274_v24 = vpop.xlane.xlu1 %2273  ;;  %v2851_v20 = vpack.c.bf16 %v2357_v4, %v2354_v46 }
 0x759   : > { %v2055_v5 = vpop.xlane.xlu0 %2054  ;;  %v3264_v32 = vpop.eup %3263  ;;  %3277 = vpow2.f32 %v2239_v48  ;;  %v2329_v34 = vadd.f32 %v4731_v23, %v4729_v63 }
 0x75a   : > { %v2119_v21 = vsub.f32 %v4544_v17, %v2055_v5  ;;  %v2120_v7 = vsub.f32 %v4547_v57, %v2055_v5  ;;  %3279 = vpow2.f32 %v2241_v47  ;;  %2850 = vmatprep.subr.bf16.mxu0 %v2849_v15  ;;  %v2361_v25 = vmul.f32 %v3264_v32, %v4521_v0 }
 0x75b   : > { %v4737_v26 = vpop.eup %3265  ;;  %3281 = vrcp.f32 %v2274_v24  ;;  %2852 = vmatpush1.bf16.xpose.msra.mxu0 %v2851_v20  ;;  %2330 = vadd.xlane.f32.xlu0 %v2329_v34  ;;  %v2360_v10 = vmul.f32 %v3264_v32, %v4517_v44 }
 0x75c   : > { %v2243_v42 = vmul.f32 1.442695, %v2119_v21  ;;  %v2245_v14 = vmul.f32 1.442695, %v2120_v7  ;;  %v4739_v27 = vpop.eup %3267  ;;  %v2058_v22 = vpop.xlane.xlu1 %2057 }
 0x75d   : > { %v3270_v17 = vpop.eup %3269  ;;  %v2277_v57 = vpop.xlane.xlu0 %2276  ;;  %v2121_v58 = vsub.f32 %v4564_v56, %v2058_v22  ;;  %v2122_v3 = vsub.f32 %v4567_v62, %v2058_v22  ;;  %v2332_v12 = vadd.f32 %v4739_v27, %v4737_v26 }
 0x75e   : > { %3283 = vpow2.f32 %v2243_v42  ;;  %v2364_v9 = vmul.f32 %v3270_v17, %v4537_v37  ;;  %v2363_v45 = vmul.f32 %v3270_v17, %v4529_v39 }
 0x75f   : > { %3285 = vpow2.f32 %v2245_v14  ;;  %v2247_v0 = vmul.f32 1.442695, %v2121_v58  ;;  %v2249_v11 = vmul.f32 1.442695, %v2122_v3  ;;  %2333 = vadd.xlane.f32.xlu1 %v2332_v12 }
 0x760   : > { %v4749_v61 = vpop.eup %3271  ;;  %3287 = vrcp.f32 %v2277_v57  ;;  %v2853_v56 = vpack.c.bf16 %v2364_v9, %v2361_v25  ;;  %v2280_v62 = vpop.xlane.xlu1 %2279  ;;  %v2855_v54 = vpack.c.bf16 %v2363_v45, %v2360_v10 }
 0x761   : > { %v4751_v49 = vpop.eup %3273  ;;  %3289 = vpow2.f32 %v2247_v0 }
 0x762   : > { %v2335_v46 = vadd.f32 %v4751_v49, %v4749_v61  ;;  %v3276_v37 = vpop.eup %3275  ;;  %3291 = vpow2.f32 %v2249_v11  ;;  %2854 = vmatprep.subr.bf16.mxu0 %v2853_v56 }
 0x763   : > { %v4755_v44 = vpop.eup %3277  ;;  %3293 = vrcp.f32 %v2280_v62  ;;  %2856 = vmatpush1.bf16.xpose.msra.mxu0 %v2855_v54  ;;  %v2367_v15 = vmul.f32 %v3276_v37, %v4553_v31  ;;  %v2366_v5 = vmul.f32 %v3276_v37, %v4549_v33 }
 0x764   : > { %2336 = vadd.xlane.f32.xlu0 %v2335_v46  ;;  %v4757_v39 = vpop.eup %3279  ;;  %v2283_v4 = vpop.xlane.xlu0 %2282 }
 0x765   : > { %v3282_v48 = vpop.eup %3281  ;;  %v2338_v47 = vadd.f32 %v4757_v39, %v4755_v44  ;;  %3295 = vrcp.f32 %v2283_v4 }
 0x766   : > { %v2370_v24 = vmul.f32 %v3282_v48, %v4569_v28  ;;  %v2369_v20 = vmul.f32 %v3282_v48, %v4561_v2 }
 0x767   : > { %2339 = vadd.xlane.f32.xlu1 %v2338_v47 }
 0x768   : > { %v4765_v32 = vpop.eup %3283  ;;  %v2857_v7 = vpack.c.bf16 %v2370_v24, %v2367_v15  ;;  %v2286_v34 = vpop.xlane.xlu1 %2285  ;;  %v2859_v42 = vpack.c.bf16 %v2369_v20, %v2366_v5 }
 0x769   : > { %v4767_v21 = vpop.eup %3285  ;;  %3297 = vrcp.f32 %v2286_v34  ;;  %v5060_v34 = vld [vmem:[#allocation5_spill] sm:$0xff] }
 0x76a   : > { %v2341_v14 = vadd.f32 %v4767_v21, %v4765_v32  ;;  %v3288_v31 = vpop.eup %3287  ;;  %2858 = vmatprep.subr.bf16.mxu0 %v2857_v7 }
 0x76b   : > { %v4771_v28 = vpop.eup %3289  ;;  %2860 = vmatpush1.bf16.xpose.msra.mxu0 %v2859_v42  ;;  %v2373_v17 = vmul.f32 %v3288_v31, %v4579_v51  ;;  %v2372_v58 = vmul.f32 %v3288_v31, %v4575_v60  ;;  %v5061_v42 = vld [vmem:[#allocation11_spill] sm:$0xff] }
 0x76c   : > { %2342 = vadd.xlane.f32.xlu0 %v2341_v14  ;;  %v4773_v33 = vpop.eup %3291  ;;  %v2289_v2 = vpop.xlane.xlu0 %2288 }
 0x76d   : > { %v3294_v22 = vpop.eup %3293  ;;  %v2344_v25 = vadd.f32 %v4773_v33, %v4771_v28  ;;  %3299 = vrcp.f32 %v2289_v2 }
 0x76e   : > { %v2376_v57 = vmul.f32 %v3294_v22, %v4587_v29  ;;  %v2375_v3 = vmul.f32 %v3294_v22, %v4585_v43 }
 0x76f   : > { %2345 = vadd.xlane.f32.xlu1 %v2344_v25  ;;  %v3296_v45 = vpop.eup %3295 }
 0x770   : > { %v2861_v12 = vpack.c.bf16 %v2376_v57, %v2373_v17  ;;  %v2292_v9 = vpop.xlane.xlu1 %2291  ;;  %v2863_v10 = vpack.c.bf16 %v2375_v3, %v2372_v58  ;;  %v2379_v56 = vmul.f32 %v3296_v45, %v4595_v6  ;;  %v2378_v60 = vmul.f32 %v3296_v45, %v4593_v36  ;;  %v5062_v17 = vld [vmem:[#allocation16_spill] sm:$0xff]  ;;  %v5063_v58 = vld [vmem:[#allocation17_spill] sm:$0xff]  ;;  %v5064_v3 = vld [vmem:[#allocation18_spill] sm:$0xff] }
 0x771   : > { %3301 = vrcp.f32 %v2292_v9 }
 0x772   : > { %2862 = vmatprep.subr.bf16.mxu0 %v2861_v12  ;;  %v5065_v12 = vld [vmem:[#allocation7_spill] sm:$0xff] }
 0x773   : > { %v3298_v0 = vpop.eup %3297  ;;  %2864 = vmatpush1.bf16.xpose.msra.mxu0 %v2863_v10 }
 0x774   : > { %v2295_v11 = vpop.xlane.xlu0 %2294  ;;  %v2382_v51 = vmul.f32 %v3298_v0, %v4603_v35  ;;  %v2381_v29 = vmul.f32 %v3298_v0, %v4601_v53 }
 0x775   : > { %3303 = vrcp.f32 %v2295_v11 }
 0x776   : > { %v2865_v43 = vpack.c.bf16 %v2382_v51, %v2379_v56  ;;  %v2867_v62 = vpack.c.bf16 %v2381_v29, %v2378_v60 }
 0x777   : > { %v3300_v46 = vpop.eup %3299 }
 0x778   : > { %2866 = vmatprep.subr.bf16.mxu0 %v2865_v43  ;;  %v2298_v54 = vpop.xlane.xlu1 %2297  ;;  %v2385_v48 = vmul.f32 %v3300_v46, %v4611_v18  ;;  %v2384_v53 = vmul.f32 %v3300_v46, %v4609_v13 }
 0x779   : > { %3305 = vrcp.f32 %v2298_v54 }
 0x77b   : > { %v3302_v37 = vpop.eup %3301  ;;  %2868 = vmatpush1.bf16.xpose.msra.mxu0 %v2867_v62 }
 0x77c   : > { %v2301_v4 = vpop.xlane.xlu0 %2300  ;;  %v2388_v6 = vmul.f32 %v3302_v37, %v4619_v52  ;;  %v2387_v35 = vmul.f32 %v3302_v37, %v4617_v55 }
 0x77d   : > { %3307 = vrcp.f32 %v2301_v4 }
 0x77e   : > { %v2869_v47 = vpack.c.bf16 %v2388_v6, %v2385_v48  ;;  %v2871_v36 = vpack.c.bf16 %v2387_v35, %v2384_v53  ;;  %v3339_v48 = vld [vmem:[%s4885_s2] sm:$0xf] }
 0x77f   : > { %v3304_v24 = vpop.eup %3303 }
 0x780   : > { %2870 = vmatprep.subr.bf16.mxu0 %v2869_v47  ;;  %v2304_v15 = vpop.xlane.xlu1 %2303  ;;  %v2391_v7 = vmul.f32 %v3304_v24, %v4627_v8  ;;  %v2390_v55 = vmul.f32 %v3304_v24, %v5061_v42  ;;  %v5069_v47 = vld [vmem:[#allocation15_spill] sm:$0xff]  ;;  %v5072_v42 = vld [vmem:[#allocation8_spill] sm:$0xff] }
 0x781   : > { %3309 = vrcp.f32 %v2304_v15 }
 0x782   : > { %2520 = vrot.lane.b32.xlu0 %v3339_v48, %s3406_s19 }
 0x783   : > { %v3306_v5 = vpop.eup %3305  ;;  %2872 = vmatpush1.bf16.xpose.msra.mxu0 %v2871_v36 }
 0x784   : > { %v2307_v20 = vpop.xlane.xlu0 %2306  ;;  %v2394_v18 = vmul.f32 %v3306_v5, %v4635_v41  ;;  %v2393_v52 = vmul.f32 %v3306_v5, %v5060_v34  ;;  %v5071_v34 = vld [vmem:[#allocation23_spill] sm:$0xff] }
 0x785   : > { %3311 = vrcp.f32 %v2307_v20 }
 0x786   : > { %v2873_v14 = vpack.c.bf16 %v2394_v18, %v2391_v7  ;;  %v2875_v13 = vpack.c.bf16 %v2393_v52, %v2390_v55  ;;  %v5070_v7 = vld [vmem:[#allocation19_spill] sm:$0xff] }
 0x787   : > { %v3308_v2 = vpop.eup %3307 }
 0x788   : > { %2874 = vmatprep.subr.bf16.mxu0 %v2873_v14  ;;  %v2310_v31 = vpop.xlane.xlu1 %2309  ;;  %v2397_v57 = vmul.f32 %v3308_v2, %v5062_v17  ;;  %v2396_v9 = vmul.f32 %v3308_v2, %v5065_v12  ;;  %v5073_v14 = vld [vmem:[#allocation21_spill] sm:$0xff] }
 0x789   : > { %3313 = vrcp.f32 %v2310_v31 }
 0x78b   : > { %v3310_v22 = vpop.eup %3309  ;;  %2876 = vmatpush1.bf16.xpose.msra.mxu0 %v2875_v13 }
 0x78c   : > { %v2313_v25 = vpop.xlane.xlu0 %2312  ;;  %v2400_v8 = vmul.f32 %v3310_v22, %v5063_v58  ;;  %v2399_v41 = vmul.f32 %v3310_v22, %v5064_v3 }
 0x78d   : > { %3315 = vrcp.f32 %v2313_v25 }
 0x78e   : > { %v2877_v10 = vpack.c.bf16 %v2400_v8, %v2397_v57  ;;  %v2879_v45 = vpack.c.bf16 %v2399_v41, %v2396_v9 }
 0x78f   : > { %v3312_v11 = vpop.eup %3311 }
 0x790   : > { %2878 = vmatprep.subr.bf16.mxu0 %v2877_v10  ;;  %v2316_v0 = vpop.xlane.xlu1 %2315  ;;  %v2403_v29 = vmul.f32 %v3312_v11, %v4659_v40  ;;  %v2402_v62 = vmul.f32 %v3312_v11, %v4657_v59  ;;  %v5068_v59 = vld [vmem:[#allocation20_spill] sm:$0xff] }
 0x791   : > { %3317 = vrcp.f32 %v2316_v0 }
 0x793   : > { %v3314_v56 = vpop.eup %3313  ;;  %2880 = vmatpush1.bf16.xpose.msra.mxu0 %v2879_v45 }
 0x794   : > { %v2319_v51 = vpop.xlane.xlu0 %2318  ;;  %v2406_v60 = vmul.f32 %v3314_v56, %v4667_v1  ;;  %v2405_v43 = vmul.f32 %v3314_v56, %v4665_v19  ;;  %v5066_v1 = vld [vmem:[#allocation6_spill] sm:$0xff] }
 0x795   : > { %3319 = vrcp.f32 %v2319_v51  ;;  %v5067_v19 = vld [vmem:[#allocation22_spill] sm:$0xff] }
 0x796   : > { %v2881_v54 = vpack.c.bf16 %v2406_v60, %v2403_v29  ;;  %v2883_v46 = vpack.c.bf16 %v2405_v43, %v2402_v62 }
 0x797   : > { %v3316_v4 = vpop.eup %3315 }
 0x798   : > { %2882 = vmatprep.subr.bf16.mxu0 %v2881_v54  ;;  %v2322_v37 = vpop.xlane.xlu1 %2321  ;;  %v2409_v6 = vmul.f32 %v3316_v4, %v5066_v1  ;;  %v2408_v36 = vmul.f32 %v3316_v4, %v5069_v47 }
 0x799   : > { %3321 = vrcp.f32 %v2322_v37 }
 0x79b   : > { %v3318_v40 = vpop.eup %3317  ;;  %2884 = vmatpush1.bf16.xpose.msra.mxu0 %v2883_v46 }
 0x79c   : > { %v2412_v35 = vmul.f32 %v3318_v40, %v5067_v19  ;;  %v2411_v53 = vmul.f32 %v3318_v40, %v5068_v59  ;;  %v5076_v59 = vld [vmem:[#allocation9_spill] sm:$0xff] }
 0x79e   : > { %v2885_v15 = vpack.c.bf16 %v2412_v35, %v2409_v6  ;;  %v2887_v24 = vpack.c.bf16 %v2411_v53, %v2408_v36 }
 0x79f   : > { %v3320_v5 = vpop.eup %3319 }
 0x7a0   : > { %2886 = vmatprep.subr.bf16.mxu0 %v2885_v15  ;;  %v2415_v18 = vmul.f32 %v3320_v5, %v5070_v7  ;;  %v2414_v13 = vmul.f32 %v3320_v5, %v5073_v14  ;;  %v3340_v5 = vld [vmem:[%s3483_s28] sm:$0xff]  ;;  %v5078_v7 = vld [vmem:[#allocation13_spill] sm:$0xff]  ;;  %s3407_s28 = smov [#allocation2]  }
 0x7a1   : > { %s3345_s6 = sshll.u32 %s3407_s28, 4  ;;  %s3346_s6 = int_to_ptr.vmem [resolvable:$false] %s3345_s6 }
 0x7a2   : > { %s3347_s7 = scalar_lea.vmem %s3346_s6, 256  ;;  %p3348_p0 = scmp.lt.s32.totalorder %s4843_s27, %s3346_s6 }
 0x7a3   : > { %v3322_v20 = vpop.eup %3321  ;;  %2888 = vmatpush1.bf16.xpose.msra.mxu0 %v2887_v24  ;;  %p3349_p1 = scmp.lt.s32.totalorder %s3347_s7, %s3341_s5 }
 0x7a4   : > { %v2418_v52 = vmul.f32 %v3322_v20, %v5071_v34  ;;  %v2417_v55 = vmul.f32 %v3322_v20, %v5072_v42  ;;  %v5077_v20 = vld [vmem:[#allocation14_spill] sm:$0xff] }
 0x7a5   : > { %p3350_p2 = por %p3349_p1, %p3348_p0 }
 0x7a6   : > { %v2889_v31 = vpack.c.bf16 %v2418_v52, %v2415_v18  ;;  %v2891_v2 = vpack.c.bf16 %v2417_v55, %v2414_v13  ;;  %v5079_v18 = vcombine.low %v5077_v20, %v5078_v7 }
 0x7a7   : > { %p3351_p3 = pnand %p3350_p2, %p3344_p13 }
 0x7a8   : > { %2890 = vmatprep.subr.bf16.mxu0 %v2889_v31  ;;  %v1481_v34 = vadd.f32 %v3340_v5, %v5079_v18 }
 0x7ab   : > { %2892 = vmatpush1.bf16.xpose.msra.mxu0 %v2891_v2 }
 0x7e0   : > { %v2325_v22 = vpop.xlane.xlu0 %2324 }
 0x7e1   : > { %3323 = vrcp.f32 %v2325_v22 }
 0x7e4   : > { %v2328_v25 = vpop.xlane.xlu1 %2327 }
 0x7e5   : > { %3325 = vrcp.f32 %v2328_v25 }
 0x7e8   : > { %v2331_v17 = vpop.xlane.xlu0 %2330 }
 0x7e9   : > { %3327 = vrcp.f32 %v2331_v17 }
 0x7eb   : > { %v3324_v58 = vpop.eup %3323 }
 0x7ec   : > { %v2334_v57 = vpop.xlane.xlu1 %2333  ;;  %v2421_v41 = vmul.f32 %v3324_v58, %v4711_v16  ;;  %v2420_v9 = vmul.f32 %v3324_v58, %v4709_v30 }
 0x7ed   : > { %3329 = vrcp.f32 %v2334_v57 }
 0x7ef   : > { %v3326_v8 = vpop.eup %3325 }
 0x7f0   : > { %v2424_v12 = vmul.f32 %v3326_v8, %v4719_v50  ;;  %v2423_v10 = vmul.f32 %v3326_v8, %v4717_v38 }
 0x7f1   : > { %v2337_v3 = vpop.xlane.xlu0 %2336 }
 0x7f2   : > { %v2893_v45 = vpack.c.bf16 %v2424_v12, %v2421_v41  ;;  %v2895_v0 = vpack.c.bf16 %v2423_v10, %v2420_v9  ;;  %3331 = vrcp.f32 %v2337_v3 }
 0x7f3   : > { %v3328_v56 = vpop.eup %3327 }
 0x7f4   : > { %2894 = vmatprep.subr.bf16.mxu0 %v2893_v45  ;;  %v2340_v11 = vpop.xlane.xlu1 %2339  ;;  %v2427_v60 = vmul.f32 %v3328_v56, %v4731_v23  ;;  %v2426_v50 = vmul.f32 %v3328_v56, %v4729_v63 }
 0x7f5   : > { %3333 = vrcp.f32 %v2340_v11  ;;  %2896 = vmatpush1.bf16.xpose.msra.mxu0 %v2895_v0 }
 0x7f7   : > { %v3330_v51 = vpop.eup %3329 }
 0x7f8   : > { %v2430_v16 = vmul.f32 %v3330_v51, %v4739_v27  ;;  %v2429_v30 = vmul.f32 %v3330_v51, %v4737_v26 }
 0x7f9   : > { %v2343_v29 = vpop.xlane.xlu0 %2342 }
 0x7fa   : > { %v2897_v43 = vpack.c.bf16 %v2430_v16, %v2427_v60  ;;  %v2899_v38 = vpack.c.bf16 %v2429_v30, %v2426_v50  ;;  %3335 = vrcp.f32 %v2343_v29 }
 0x7fc   : > { %2898 = vmatprep.subr.bf16.mxu0 %v2897_v43  ;;  %v2346_v62 = vpop.xlane.xlu1 %2345  ;;  %v3332_v54 = vpop.eup %3331 }
 0x7fd   : > { %3337 = vrcp.f32 %v2346_v62  ;;  %2900 = vmatpush1.bf16.xpose.msra.mxu0 %v2899_v38  ;;  %v2433_v37 = vmul.f32 %v3332_v54, %v4751_v49  ;;  %v2432_v23 = vmul.f32 %v3332_v54, %v4749_v61  ;;  %v5074_v61 = vld [vmem:[#allocation10_spill] sm:$0xff] }
 0x7ff   : > { %v3334_v46 = vpop.eup %3333 }
 0x800   : > { %v2436_v4 = vmul.f32 %v3334_v46, %v4757_v39  ;;  %v2435_v27 = vmul.f32 %v3334_v46, %v4755_v44  ;;  %v5075_v44 = vld [vmem:[#allocation12_spill] sm:$0xff] }
 0x802   : > { %v2901_v63 = vpack.c.bf16 %v2436_v4, %v2433_v37  ;;  %v2903_v48 = vpack.c.bf16 %v2435_v27, %v2432_v23 }
 0x804   : > { %2902 = vmatprep.subr.bf16.mxu0 %v2901_v63  ;;  %v3336_v26 = vpop.eup %3335 }
 0x805   : > { %2904 = vmatpush1.bf16.xpose.msra.mxu0 %v2903_v48  ;;  %v2439_v1 = vmul.f32 %v3336_v26, %v4767_v21  ;;  %v2438_v19 = vmul.f32 %v3336_v26, %v4765_v32 }
 0x807   : > { %v3338_v40 = vpop.eup %3337 }
 0x808   : > { %v2442_v6 = vmul.f32 %v3338_v40, %v4773_v33  ;;  %v2441_v49 = vmul.f32 %v3338_v40, %v4771_v28  ;;  %v2521_v28 = vpop.permute.xlu0 %2520 }
 0x80a   : > { %v2905_v35 = vpack.c.bf16 %v2442_v6, %v2439_v1  ;;  %v2907_v39 = vpack.c.bf16 %v2441_v49, %v2438_v19 }
 0x80c   : > { %2906 = vmatprep.subr.bf16.mxu0 %v2905_v35 }
 0x80d   : > { %2908 = vmatpush1.bf16.xpose.msra.mxu0 %v2907_v39 }
 0x814   : > { %2508 = vmatmul.mubr.f32.vlgmr.msra.gmra.mrb[28].mxu0 %v5074_v61 }
 0x815   : > { %2513 = vmatprep.mubr.f32.mxu0 %v5075_v44 }
 0x818   : > { %2514 = vmatmul.mubr.f32.gmra.mrb[30].mxu0 %v5076_v59 }
 0x8e7   : > { %v2509_v53 = vpop.f32.mrb[28].mxu0 }
 0x8e8   : > { %v2511_v21 = vpop.f32.mrb[29].mxu0 }
 0x8eb   : > { %v2515_v33 = vpop.f32.mrb[30].mxu0 }
 0x8ec   : > { %v2911_v47 = vpack.c.bf16 %v2515_v33, %v2509_v53  ;;  %v2517_v32 = vpop.f32.mrb[31].mxu0 }
 0x8ed   : > { %v2909_v36 = vpack.c.bf16 %v2517_v32, %v2511_v21 }
 0x8ef   : > { %2910 = vmatprep.subr.bf16.mxu1 %v2909_v36 }
 0x8f0   : > { %2912 = vmatpush1.bf16.msra.mxu1 %v2911_v47 }
 0x8f3   : > { %2761 = vmatmul.mubr.msk.f32.vlgmr.msra.gmra.mrb[130].mxu1 %vm428_vm2, %v2521_v28 }
 0x9c6   : > { %v2590_v15 = vpop.f32.mrb[130].mxu1 }
 0x9c7   : > { %v2592_v24 = vpop.f32.mrb[131].mxu1 }
 0x9c8   : > { %v2597_v52 = vcombine.low %v2590_v15, %v2592_v24 }
 0x9ca   : > { %v2599_v42 = vadd.f32 %v2597_v52, %v1481_v34 }
 0x9cc   : > { %2600 = vst [vmem:[%s163_s26] sm:$0xff] %v2599_v42 }
 0x9cd   : > { %3354 = shalt.err (!%p3351_p3)
}
 0x9ce   : > { %s3355_s8 = scalar_lea.hbm %s4841_s4, 128  ;;  %s3359_s11 = scalar_lea.hbm %s4886_s3, 256 }
 0x9cf   : > { %p3356_p4 = scmp.ne.s32.totalorder %s4841_s4, %s3355_s8  ;;  %p3360_p9 = scmp.lt.u32.totalorder %s4841_s4, %s4886_s3 }
 0x9d0   : > { %p3361_p10 = scmp.lt.u32.totalorder %s3359_s11, %s3355_s8  ;;  %p3363_p12 = scmp.lt.u32.totalorder %s3355_s8, %s4841_s4 }
 0x9d1   : > { %p3357_p7 = pnand %p3356_p4, %p3466_p5 }
 0x9d2   : > { %p3362_p11 = por %p3361_p10, %p3360_p9 }
 0x9d3   : > { %p3358_p8 = pneg %p3357_p7 }
 0x9d4   : > { %p3364_p13 = por %p3363_p12, %p3362_p11 }
 0x9d6   : > { %p3365_p0 = pnand %p3364_p13, %p3358_p8 }
 0x9d8   : > { %3368 = shalt.err (!%p3365_p0)
}
 0x9d9   : > { %2913 = dma.vmem_to_hbm [thread:$0]  (%p3466_p5), %s4843_s27, 128, %s4841_s4, %s2602_s16  }
 0x9da PF: > { %p2919_p1 = scmp.ge.s32.totalorder %s3403_s15, 2  ;;  %s2628_s20 = sand.u32 1, %s3391_s12  }
 0x9db   : > { %s2629_s24 = scalar_lea.sflag [#allocation3], %s2628_s20 }
 0x9dc   : > { %p2916_p2 = pnand %p2919_p1, %p3470_p6 }
 0x9de   : > { %3386 = dma.done.wait (!%p2916_p2), %s2629_s24, 128  }
 0x9df   : > { %3388 = vsyncadd (!%p2916_p2), %s2629_s24, 4294967168  ;;  %p13_p3 = scmp.ge.s32.totalorder %s3453_s18, 4   ;;  %s5080_s12 = smov %s3395_s13 }
 0x9e0   : > { %s5081_s13 = smov %s3399_s14  ;;  %s5082_s14 = smov %s3464_s21 }
 0x9e1   : > { %s5083_s15 = smov %s3453_s18  ;;  %15 = sbr.rel (!%p13_p3) target bundleno = 3 (0x3), region = 67 }
 0x9e8   :  { %2634 = vsyncpa [#allocation3], 1 }
 0x9e9   :  { %2636 = vsyncpa [#allocation3 + $0x1], 1 }

</bundles_post_ra>
